<compile_context>
chip_gen: v7x
topology: tpu7x:2x2x1
jax: 0.10.0
libtpu: 0.0.40
codegen_flags: <defaults>
</compile_context>

<pallas_src>
import jax
import jax.numpy as jnp
from jax.experimental import pallas as pl
from jax.experimental.pallas import tpu as pltpu

PAD_OUT = 128          # final classifier padded to a full lane width
HID = (1024, 512, 256, 128)
# packed bias table offsets: [shift1 | shift2 | shift3 | shift4 | b5_pad] = 2048
_OFF = (0, 1024, 1536, 1792, 1920, 2048)


def deep_ensemble_kernel(x_ref, w1_ref, w2_ref, w3_ref, w4_ref, w5_ref,
                         bias_ref, out_ref):
    """Fused 5-layer MLP: bf16 matmuls (f32 accumulate) + folded-BN shift + ReLU."""
    h = x_ref[...]                                                     # bf16

    # layer 1: Linear (BN folded into W/shift) -> ReLU  (Dropout = identity)
    h = jnp.dot(h, w1_ref[...], preferred_element_type=jnp.float32)
    h = jnp.maximum(h + bias_ref[:, _OFF[0]:_OFF[1]], 0.0).astype(jnp.bfloat16)

    # layer 2
    h = jnp.dot(h, w2_ref[...], preferred_element_type=jnp.float32)
    h = jnp.maximum(h + bias_ref[:, _OFF[1]:_OFF[2]], 0.0).astype(jnp.bfloat16)

    # layer 3
    h = jnp.dot(h, w3_ref[...], preferred_element_type=jnp.float32)
    h = jnp.maximum(h + bias_ref[:, _OFF[2]:_OFF[3]], 0.0).astype(jnp.bfloat16)

    # layer 4
    h = jnp.dot(h, w4_ref[...], preferred_element_type=jnp.float32)
    h = jnp.maximum(h + bias_ref[:, _OFF[3]:_OFF[4]], 0.0).astype(jnp.bfloat16)

    # final classifier (output padded to 128 lanes -> dense vst)
    out = jnp.dot(h, w5_ref[...], preferred_element_type=jnp.float32)
    out_ref[...] = out + bias_ref[:, _OFF[4]:_OFF[5]]


def init_params(key, input_dim, num_classes, dtype=jnp.float32):
    """Deterministic synthetic parameters matching the PyTorch module shapes."""
    dims = [input_dim, *HID, num_classes]
    params = []
    for li in range(5):
        d_in, d_out = dims[li], dims[li + 1]
        key, kw, kb = jax.random.split(key, 3)
        # PyTorch Linear stores (out, in); we keep (in, out) for x @ W.
        w = jax.random.normal(kw, (d_in, d_out), dtype) * (1.0 / jnp.sqrt(d_in))
        b = jax.random.normal(kb, (d_out,), dtype) * 0.01
        layer = {"w": w, "b": b}
        if li < 4:  # hidden layers have BatchNorm1d
            key, kg, kbeta, km, kv = jax.random.split(key, 5)
            layer["gamma"] = 1.0 + 0.1 * jax.random.normal(kg, (d_out,), dtype)
            layer["beta"] = 0.1 * jax.random.normal(kbeta, (d_out,), dtype)
            layer["running_mean"] = 0.05 * jax.random.normal(km, (d_out,), dtype)
            layer["running_var"] = 1.0 + 0.1 * jax.random.uniform(kv, (d_out,), dtype)
        params.append(layer)
    return params


def prepare_kernel_params(params, eps=1e-5, weight_dtype=jnp.bfloat16):
    """One-time (offline) parameter prep.

    Folds eval-mode BN into the weight columns / a per-feature shift, casts the
    weights to bf16, pads the final classifier to 128 lanes, and packs all
    shift/bias vectors into a single (1, 2048) f32 table.
    """
    ws, shifts = [], []
    for li in range(4):
        p = params[li]
        inv_std = 1.0 / jnp.sqrt(p["running_var"].astype(jnp.float32) + eps)
        scale = p["gamma"].astype(jnp.float32) * inv_std
        shift = (p["beta"].astype(jnp.float32)
                 - p["running_mean"].astype(jnp.float32) * scale
                 + p["b"].astype(jnp.float32) * scale)
        ws.append((p["w"].astype(jnp.float32) * scale[None, :]).astype(weight_dtype))
        shifts.append(shift)

    w5 = params[4]["w"].astype(jnp.float32)
    b5 = params[4]["b"].astype(jnp.float32)
    n_cls = w5.shape[1]
    pad = PAD_OUT - n_cls
    ws.append(jnp.pad(w5, ((0, 0), (0, pad))).astype(weight_dtype))
    shifts.append(jnp.pad(b5, (0, pad)))

    bias_table = jnp.concatenate(shifts).reshape(1, -1)   # (1, 2048) f32
    return ws, bias_table


def _choose_tile_b(batch):
    if batch >= 512:
        return 512
    return ((batch + 7) // 8) * 8      # small batch: single 8-row-aligned tile


def deep_ensemble_forward(x, kernel_ws, bias_table, num_classes):
    """Run the fused kernel. Returns (B, num_classes) f32."""
    B, D = x.shape
    tile_b = _choose_tile_b(B)
    b_pad = ((B + tile_b - 1) // tile_b) * tile_b
    if b_pad != B:
        x = jnp.pad(x, ((0, b_pad - B), (0, 0)))
    x = x.astype(jnp.bfloat16)

    w1, w2, w3, w4, w5 = kernel_ws
    grid = (b_pad // tile_b,)

    in_specs = [
        pl.BlockSpec((tile_b, D), lambda i: (i, 0)),            # x: tiled per step
        pl.BlockSpec(w1.shape, lambda i: (0, 0)),               # weights: resident
        pl.BlockSpec(w2.shape, lambda i: (0, 0)),
        pl.BlockSpec(w3.shape, lambda i: (0, 0)),
        pl.BlockSpec(w4.shape, lambda i: (0, 0)),
        pl.BlockSpec(w5.shape, lambda i: (0, 0)),
        pl.BlockSpec(bias_table.shape, lambda i: (0, 0)),       # packed shifts
    ]

    out = pl.pallas_call(
        deep_ensemble_kernel,
        out_shape=jax.ShapeDtypeStruct((b_pad, PAD_OUT), jnp.float32),
        grid=grid,
        in_specs=in_specs,
        out_specs=pl.BlockSpec((tile_b, PAD_OUT), lambda i: (i, 0)),
        compiler_params=pltpu.CompilerParams(
            dimension_semantics=("parallel",),
            vmem_limit_bytes=32 << 20,
        ),
    )(x, w1, w2, w3, w4, w5, bias_table)

    return out[:B, :num_classes]


def reference_forward(x, params, eps=1e-5):
    """Pure-JAX f32 reference mirroring PyTorch eval-mode forward."""
    h = x
    for li in range(4):
        p = params[li]
        h = h @ p["w"] + p["b"]
        h = (h - p["running_mean"]) / jnp.sqrt(p["running_var"] + eps)
        h = p["gamma"] * h + p["beta"]
        h = jnp.maximum(h, 0.0)          # ReLU; Dropout is identity in eval
    return h @ params[4]["w"] + params[4]["b"]


if __name__ == "__main__":
    # Small config consistent with the module: input_dim = base_models_ct * num_classes
    config = {
        "base_models_ct": 4,
        "num_classes": 8,
        "activation_func": "relu",
        "dropout_rate": 0.1,
        "model_name": "deep_ensemble",
    }
    input_dim = config["base_models_ct"] * config["num_classes"]   # 32
    batch = 8

    key = jax.random.PRNGKey(0)
    key, kx = jax.random.split(key)
    x = jax.random.normal(kx, (batch, input_dim), jnp.float32)

    params = init_params(key, input_dim, config["num_classes"])

    # Offline parameter preparation (BN fold, bf16 cast, packing) — done once.
    kernel_ws, bias_table = prepare_kernel_params(params)

    out = deep_ensemble_forward(x, kernel_ws, bias_table, config["num_classes"])
    out = jax.block_until_ready(out)

    ref = reference_forward(x, params)
    assert out.shape == (batch, config["num_classes"])

    # bf16 weights/activations (f32 accumulation) -> looser tolerance than f32.
    max_err = jnp.max(jnp.abs(out - ref))
    scale = jnp.max(jnp.abs(ref)) + 1e-6
    assert max_err / scale < 5e-2, f"relative max err {max_err / scale}"

    print("KERNEL_OK")
</pallas_src>

<mosaic_0001>
module attributes {stable_mosaic.version = 11 : i64} {
  func.func @deep_ensemble_kernel(%arg0: i32, %arg1: memref<8x32xbf16, #tpu.memory_space<vmem>>, %arg2: memref<32x1024xbf16, #tpu.memory_space<vmem>>, %arg3: memref<1024x512xbf16, #tpu.memory_space<vmem>>, %arg4: memref<512x256xbf16, #tpu.memory_space<vmem>>, %arg5: memref<256x128xbf16, #tpu.memory_space<vmem>>, %arg6: memref<128x128xbf16, #tpu.memory_space<vmem>>, %arg7: memref<1x2048xf32, #tpu.memory_space<vmem>>, %arg8: memref<8x128xf32, #tpu.memory_space<vmem>>) attributes {dimension_semantics = [#tpu.dimension_semantics<parallel>], iteration_bounds = array<i64: 1>, scalar_prefetch = 0 : i64, scratch_operands = 0 : i64, tpu.core_type = #tpu.core_type<tc>, window_params = [{transform_indices = @transform_0, window_bounds = array<i64: 8, 32>}, {pipeline_mode = #tpu.pipeline_mode<synchronous>, transform_indices = @transform_1, window_bounds = array<i64: 32, 1024>}, {pipeline_mode = #tpu.pipeline_mode<synchronous>, transform_indices = @transform_2, window_bounds = array<i64: 1024, 512>}, {pipeline_mode = #tpu.pipeline_mode<synchronous>, transform_indices = @transform_3, window_bounds = array<i64: 512, 256>}, {pipeline_mode = #tpu.pipeline_mode<synchronous>, transform_indices = @transform_4, window_bounds = array<i64: 256, 128>}, {pipeline_mode = #tpu.pipeline_mode<synchronous>, transform_indices = @transform_5, window_bounds = array<i64: 128, 128>}, {pipeline_mode = #tpu.pipeline_mode<synchronous>, transform_indices = @transform_6, window_bounds = array<i64: 1, 2048>}, {transform_indices = @transform_7, window_bounds = array<i64: 8, 128>}]} {
    %c0 = arith.constant 0 : index
    %c0_0 = arith.constant 0 : index
    %0 = vector.load %arg1[%c0, %c0_0] : memref<8x32xbf16, #tpu.memory_space<vmem>>, vector<8x32xbf16>
    %c0_1 = arith.constant 0 : index
    %c0_2 = arith.constant 0 : index
    %1 = vector.load %arg2[%c0_1, %c0_2] : memref<32x1024xbf16, #tpu.memory_space<vmem>>, vector<32x1024xbf16>
    %cst = arith.constant dense<0.000000e+00> : vector<8x1024xf32>
    %2 = tpu.matmul %0, %1, %cst {dimension_numbers = #tpu.dot_dimension_numbers<[1], [0], [0], [1], [0, 0, 1, 1], [], []>} : vector<8x32xbf16>, vector<32x1024xbf16>, vector<8x1024xf32> -> vector<8x1024xf32>
    %c0_3 = arith.constant 0 : index
    %c0_4 = arith.constant 0 : index
    %3 = vector.load %arg7[%c0_3, %c0_4] : memref<1x2048xf32, #tpu.memory_space<vmem>>, vector<1x1024xf32>
    %4 = vector.broadcast %3 : vector<1x1024xf32> to vector<8x1024xf32>
    %5 = arith.addf %2, %4 : vector<8x1024xf32>
    %cst_5 = arith.constant 0.000000e+00 : f32
    %6 = vector.broadcast %cst_5 : f32 to vector<8x1024xf32>
    %7 = arith.maximumf %5, %6 : vector<8x1024xf32>
    %8 = arith.truncf %7 : vector<8x1024xf32> to vector<8x1024xbf16>
    %c0_6 = arith.constant 0 : index
    %c0_7 = arith.constant 0 : index
    %9 = vector.load %arg3[%c0_6, %c0_7] : memref<1024x512xbf16, #tpu.memory_space<vmem>>, vector<1024x512xbf16>
    %cst_8 = arith.constant dense<0.000000e+00> : vector<8x512xf32>
    %10 = tpu.matmul %8, %9, %cst_8 {dimension_numbers = #tpu.dot_dimension_numbers<[1], [0], [0], [1], [0, 0, 1, 1], [], []>} : vector<8x1024xbf16>, vector<1024x512xbf16>, vector<8x512xf32> -> vector<8x512xf32>
    %c0_9 = arith.constant 0 : index
    %c1024 = arith.constant 1024 : index
    %11 = vector.load %arg7[%c0_9, %c1024] : memref<1x2048xf32, #tpu.memory_space<vmem>>, vector<1x512xf32>
    %12 = vector.broadcast %11 : vector<1x512xf32> to vector<8x512xf32>
    %13 = arith.addf %10, %12 : vector<8x512xf32>
    %cst_10 = arith.constant 0.000000e+00 : f32
    %14 = vector.broadcast %cst_10 : f32 to vector<8x512xf32>
    %15 = arith.maximumf %13, %14 : vector<8x512xf32>
    %16 = arith.truncf %15 : vector<8x512xf32> to vector<8x512xbf16>
    %c0_11 = arith.constant 0 : index
    %c0_12 = arith.constant 0 : index
    %17 = vector.load %arg4[%c0_11, %c0_12] : memref<512x256xbf16, #tpu.memory_space<vmem>>, vector<512x256xbf16>
    %cst_13 = arith.constant dense<0.000000e+00> : vector<8x256xf32>
    %18 = tpu.matmul %16, %17, %cst_13 {dimension_numbers = #tpu.dot_dimension_numbers<[1], [0], [0], [1], [0, 0, 1, 1], [], []>} : vector<8x512xbf16>, vector<512x256xbf16>, vector<8x256xf32> -> vector<8x256xf32>
    %c0_14 = arith.constant 0 : index
    %c1536 = arith.constant 1536 : index
    %19 = vector.load %arg7[%c0_14, %c1536] : memref<1x2048xf32, #tpu.memory_space<vmem>>, vector<1x256xf32>
    %20 = vector.broadcast %19 : vector<1x256xf32> to vector<8x256xf32>
    %21 = arith.addf %18, %20 : vector<8x256xf32>
    %cst_15 = arith.constant 0.000000e+00 : f32
    %22 = vector.broadcast %cst_15 : f32 to vector<8x256xf32>
    %23 = arith.maximumf %21, %22 : vector<8x256xf32>
    %24 = arith.truncf %23 : vector<8x256xf32> to vector<8x256xbf16>
    %c0_16 = arith.constant 0 : index
    %c0_17 = arith.constant 0 : index
    %25 = vector.load %arg5[%c0_16, %c0_17] : memref<256x128xbf16, #tpu.memory_space<vmem>>, vector<256x128xbf16>
    %cst_18 = arith.constant dense<0.000000e+00> : vector<8x128xf32>
    %26 = tpu.matmul %24, %25, %cst_18 {dimension_numbers = #tpu.dot_dimension_numbers<[1], [0], [0], [1], [0, 0, 1, 1], [], []>} : vector<8x256xbf16>, vector<256x128xbf16>, vector<8x128xf32> -> vector<8x128xf32>
    %c0_19 = arith.constant 0 : index
    %c1792 = arith.constant 1792 : index
    %27 = vector.load %arg7[%c0_19, %c1792] : memref<1x2048xf32, #tpu.memory_space<vmem>>, vector<1x128xf32>
    %28 = vector.broadcast %27 : vector<1x128xf32> to vector<8x128xf32>
    %29 = arith.addf %26, %28 : vector<8x128xf32>
    %cst_20 = arith.constant 0.000000e+00 : f32
    %30 = vector.broadcast %cst_20 : f32 to vector<8x128xf32>
    %31 = arith.maximumf %29, %30 : vector<8x128xf32>
    %32 = arith.truncf %31 : vector<8x128xf32> to vector<8x128xbf16>
    %c0_21 = arith.constant 0 : index
    %c0_22 = arith.constant 0 : index
    %33 = vector.load %arg6[%c0_21, %c0_22] : memref<128x128xbf16, #tpu.memory_space<vmem>>, vector<128x128xbf16>
    %cst_23 = arith.constant dense<0.000000e+00> : vector<8x128xf32>
    %34 = tpu.matmul %32, %33, %cst_23 {dimension_numbers = #tpu.dot_dimension_numbers<[1], [0], [0], [1], [0, 0, 1, 1], [], []>} : vector<8x128xbf16>, vector<128x128xbf16>, vector<8x128xf32> -> vector<8x128xf32>
    %c0_24 = arith.constant 0 : index
    %c1920 = arith.constant 1920 : index
    %35 = vector.load %arg7[%c0_24, %c1920] : memref<1x2048xf32, #tpu.memory_space<vmem>>, vector<1x128xf32>
    %36 = vector.broadcast %35 : vector<1x128xf32> to vector<8x128xf32>
    %37 = arith.addf %34, %36 : vector<8x128xf32>
    %c0_25 = arith.constant 0 : index
    %c0_26 = arith.constant 0 : index
    %38 = vector.load %arg8[%c0_25, %c0_26] : memref<8x128xf32, #tpu.memory_space<vmem>>, vector<8x128xf32>
    tpu.vector_store %arg8[%c0_25, %c0_26], %37 {strides = array<i32>} : memref<8x128xf32, #tpu.memory_space<vmem>>, vector<8x128xf32>,
    return
  }
  func.func @transform_0(%arg0: i32) -> (i32, i32) {
    %c0_i32 = arith.constant 0 : i32
    %c0_i32_0 = arith.constant 0 : i32
    return %arg0, %c0_i32 : i32, i32
  }
  func.func @transform_1(%arg0: i32) -> (i32, i32) {
    %c0_i32 = arith.constant 0 : i32
    %c0_i32_0 = arith.constant 0 : i32
    %c0_i32_1 = arith.constant 0 : i32
    return %c0_i32, %c0_i32_0 : i32, i32
  }
  func.func @transform_2(%arg0: i32) -> (i32, i32) {
    %c0_i32 = arith.constant 0 : i32
    %c0_i32_0 = arith.constant 0 : i32
    %c0_i32_1 = arith.constant 0 : i32
    return %c0_i32, %c0_i32_0 : i32, i32
  }
  func.func @transform_3(%arg0: i32) -> (i32, i32) {
    %c0_i32 = arith.constant 0 : i32
    %c0_i32_0 = arith.constant 0 : i32
    %c0_i32_1 = arith.constant 0 : i32
    return %c0_i32, %c0_i32_0 : i32, i32
  }
  func.func @transform_4(%arg0: i32) -> (i32, i32) {
    %c0_i32 = arith.constant 0 : i32
    %c0_i32_0 = arith.constant 0 : i32
    %c0_i32_1 = arith.constant 0 : i32
    return %c0_i32, %c0_i32_0 : i32, i32
  }
  func.func @transform_5(%arg0: i32) -> (i32, i32) {
    %c0_i32 = arith.constant 0 : i32
    %c0_i32_0 = arith.constant 0 : i32
    %c0_i32_1 = arith.constant 0 : i32
    return %c0_i32, %c0_i32_0 : i32, i32
  }
  func.func @transform_6(%arg0: i32) -> (i32, i32) {
    %c0_i32 = arith.constant 0 : i32
    %c0_i32_0 = arith.constant 0 : i32
    %c0_i32_1 = arith.constant 0 : i32
    return %c0_i32, %c0_i32_0 : i32, i32
  }
  func.func @transform_7(%arg0: i32) -> (i32, i32) {
    %c0_i32 = arith.constant 0 : i32
    %c0_i32_0 = arith.constant 0 : i32
    return %arg0, %c0_i32 : i32, i32
  }
}

</mosaic_0001>

<bundles_post_ra>
// kernel: tpu_custom_call.1
= control target key start
LH: loop header
LB: loop body
LE: loop exit
PB: predicated region body
PF: predicated region fallthrough
CT: control target
= control target key end

     0   :  { %12 = vsyncpa [#allocation3], 0  ;;  %s4491_s0 = inlined_call_operand.hbm [shape: bf16[8,32], index: 0, kind: input, shape index: {}]   ;;  %s4492_s1 = inlined_call_operand.hbm [shape: bf16[32,1024], index: 1, kind: input, shape index: {}]   ;;  %s4493_s2 = inlined_call_operand.hbm [shape: bf16[1024,512], index: 2, kind: input, shape index: {}]   ;;  %s4494_s3 = inlined_call_operand.hbm [shape: bf16[512,256], index: 3, kind: input, shape index: {}]   ;;  %s4495_s4 = inlined_call_operand.hbm [shape: bf16[256,128], index: 4, kind: input, shape index: {}]   ;;  %s4496_s5 = inlined_call_operand.hbm [shape: bf16[128,128], index: 5, kind: input, shape index: {}]   ;;  %s4497_s6 = inlined_call_operand.vmem [shape: f32[1,2048], index: 6, kind: input, shape index: {}]   ;;  %s4498_s7 = inlined_call_operand.hbm [shape: f32[8,128], index: 7, kind: output, shape index: {}]  }
   0x1   :  { %13 = vsyncpa [#allocation6], 0 }
   0x2   :  { %14 = vsyncpa [#allocation9], 0 }
   0x3   :  { %15 = vsyncpa [#allocation12], 0 }
   0x4   :  { %16 = vsyncpa [#allocation4], 0  ;;  %s4251_s24 = smov [#allocation5]   ;;  %s4087_s28 = scalar_lea.hbm %s4492_s1, 2048 }
   0x5   :  { %s32_s25 = sshll.u32 %s4251_s24, 4  ;;  %p4088_p0 = scmp.ne.s32.totalorder %s4492_s1, %s4087_s28  ;;  %s33_s25 = int_to_ptr.vmem [resolvable:$true] %s32_s25 }
   0x6   :  { %p4091_p1 = scmp.lt.u32.totalorder %s4087_s28, %s4492_s1 }
   0x8   :  { %p4093_p2 = pnand %p4091_p1, %p4088_p0 }
   0xa   :  { %4096 = shalt.err (!%p4093_p2)
}
   0xb   :  { %s4097_s10 = scalar_lea.vmem %s33_s25, 2048  ;;  %p4102_p4 = scmp.lt.s32.totalorder %s33_s25, %s33_s25 }
   0xc   :  { %p4098_p3 = scmp.ne.s32.totalorder %s33_s25, %s4097_s10  ;;  %p4103_p5 = scmp.lt.s32.totalorder %s4097_s10, %s4097_s10 }
   0xe   :  { %p4104_p6 = por %p4103_p5, %p4102_p4 }
  0x10   :  { %p4105_p7 = pnand %p4104_p6, %p4098_p3 }
  0x12   :  { %4108 = shalt.err (!%p4105_p7)
}
  0x13   :  { %s4252_s11 = smov 512   ;;  %s4253_s12 = smov 32  }
  0x14   :  { %38 = dma.hbm_to_vmem [thread:$0]  %s4492_s1, 2048, %s33_s25, [#allocation6], %s4252_s11, %s4252_s11, %s4253_s12  }
  0x15   :  { %s4254_s15 = smov [#allocation8]   ;;  %s4109_s19 = scalar_lea.hbm %s4494_s3, 8192 }
  0x16   :  { %s56_s16 = sshll.u32 %s4254_s15, 4  ;;  %p4110_p8 = scmp.ne.s32.totalorder %s4494_s3, %s4109_s19  ;;  %s57_s16 = int_to_ptr.vmem [resolvable:$true] %s56_s16 }
  0x17   :  { %p4113_p9 = scmp.lt.u32.totalorder %s4109_s19, %s4494_s3 }
  0x19   :  { %p4115_p10 = pnand %p4113_p9, %p4110_p8 }
  0x1b   :  { %4118 = shalt.err (!%p4115_p10)
}
  0x1c   :  { %s4119_s24 = scalar_lea.vmem %s57_s16, 8192  ;;  %p4124_p12 = scmp.lt.s32.totalorder %s57_s16, %s57_s16 }
  0x1d   :  { %p4120_p11 = scmp.ne.s32.totalorder %s57_s16, %s4119_s24  ;;  %p4125_p13 = scmp.lt.s32.totalorder %s4119_s24, %s4119_s24 }
  0x1f   :  { %p4126_p0 = por %p4125_p13, %p4124_p12 }
  0x21   :  { %p4127_p1 = pnand %p4126_p0, %p4120_p11 }
  0x23   :  { %4130 = shalt.err (!%p4127_p1)
}
  0x24   :  { %s4255_s1 = smov 128   ;;  %s4256_s25 = smov 8  }
  0x25   :  { %62 = dma.hbm_to_vmem [thread:$0]  %s4494_s3, 8192, %s57_s16, [#allocation9], %s4255_s1, %s4255_s1, %s4256_s25  }
  0x26   :  { %s4257_s28 = smov [#allocation2]   ;;  %s4258_s30 = smov [#allocation7]  }
  0x27   :  { %s23_s29 = sshll.u32 %s4257_s28, 4  ;;  %s44_s8 = sshll.u32 %s4258_s30, 4  ;;  %s24_s29 = int_to_ptr.vmem [resolvable:$true] %s23_s29  ;;  %s4333_s8 = int_to_ptr.vmem [resolvable:$true] %s44_s8 }
  0x28   :  { %s4131_s11 = scalar_lea.hbm %s4491_s0, 64 }
  0x29   :  { %p4132_p2 = scmp.ne.s32.totalorder %s4491_s0, %s4131_s11  ;;  %p4135_p3 = scmp.lt.u32.totalorder %s4131_s11, %s4491_s0 }
  0x2b   :  { %p4137_p4 = pnand %p4135_p3, %p4132_p2 }
  0x2d   :  { %4140 = shalt.err (!%p4137_p4)
}
  0x2e   :  { %s4141_s3 = scalar_lea.vmem %s24_s29, 64  ;;  %p4146_p6 = scmp.lt.s32.totalorder %s24_s29, %s24_s29 }
  0x2f   :  { %p4142_p5 = scmp.ne.s32.totalorder %s24_s29, %s4141_s3  ;;  %p4147_p7 = scmp.lt.s32.totalorder %s4141_s3, %s4141_s3 }
  0x31   :  { %p4148_p8 = por %p4147_p7, %p4146_p6 }
  0x33   :  { %p4149_p9 = pnand %p4148_p8, %p4142_p5 }
  0x35   :  { %4152 = shalt.err (!%p4149_p9)
}
  0x36   :  { %26 = dma.hbm_to_vmem [thread:$0]  %s4491_s0, 64, %s24_s29, [#allocation3]  }
  0x37   :  { %s4153_s20 = scalar_lea.hbm %s4493_s2, 32768 }
  0x38   :  { %p4154_p10 = scmp.ne.s32.totalorder %s4493_s2, %s4153_s20  ;;  %p4157_p11 = scmp.lt.u32.totalorder %s4153_s20, %s4493_s2 }
  0x3a   :  { %p4159_p12 = pnand %p4157_p11, %p4154_p10 }
  0x3c   :  { %4162 = shalt.err (!%p4159_p12)
}
  0x3d   :  { %s4163_s1 = scalar_lea.vmem %s4333_s8, 32768  ;;  %p4168_p0 = scmp.lt.s32.totalorder %s4333_s8, %s4333_s8 }
  0x3e   :  { %p4164_p13 = scmp.ne.s32.totalorder %s4333_s8, %s4163_s1  ;;  %p4169_p1 = scmp.lt.s32.totalorder %s4163_s1, %s4163_s1 }
  0x40   :  { %p4170_p2 = por %p4169_p1, %p4168_p0 }
  0x42   :  { %p4171_p3 = pnand %p4170_p2, %p4164_p13 }
  0x44   :  { %4174 = shalt.err (!%p4171_p3)
}
  0x45   :  { %s4259_s0 = smov 256   ;;  %s4260_s25 = smov 16  }
  0x46   :  { %50 = dma.hbm_to_vmem [thread:$0]  %s4493_s2, 32768, %s4333_s8, [#allocation6], %s4259_s0, %s4259_s0, %s4260_s25  }
  0x47   :  { %s4261_s28 = smov [#allocation10]   ;;  %s4175_s10 = scalar_lea.hbm %s4495_s4, 2048 }
  0x48   :  { %s68_s29 = sshll.u32 %s4261_s28, 4  ;;  %p4176_p4 = scmp.ne.s32.totalorder %s4495_s4, %s4175_s10  ;;  %s69_s29 = int_to_ptr.vmem [resolvable:$true] %s68_s29 }
  0x49   :  { %p4179_p5 = scmp.lt.u32.totalorder %s4175_s10, %s4495_s4 }
  0x4b   :  { %p4181_p6 = pnand %p4179_p5, %p4176_p4 }
  0x4d   :  { %4184 = shalt.err (!%p4181_p6)
}
  0x4e   :  { %s4185_s15 = scalar_lea.vmem %s69_s29, 2048  ;;  %p4190_p8 = scmp.lt.s32.totalorder %s69_s29, %s69_s29 }
  0x4f   :  { %p4186_p7 = scmp.ne.s32.totalorder %s69_s29, %s4185_s15  ;;  %p4191_p9 = scmp.lt.s32.totalorder %s4185_s15, %s4185_s15 }
  0x51   :  { %p4192_p10 = por %p4191_p9, %p4190_p8 }
  0x53   :  { %p4193_p11 = pnand %p4192_p10, %p4186_p7 }
  0x55   :  { %4196 = shalt.err (!%p4193_p11)
}
  0x56   :  { %s4262_s2 = smov 64   ;;  %s4263_s8 = smov 4  }
  0x57   :  { %74 = dma.hbm_to_vmem [thread:$0]  %s4495_s4, 2048, %s69_s29, [#allocation9], %s4262_s2, %s4262_s2, %s4263_s8  }
  0x58   :  { %s4264_s17 = smov [#allocation11]   ;;  %s4197_s21 = scalar_lea.hbm %s4496_s5, 1024 }
  0x59   :  { %s80_s18 = sshll.u32 %s4264_s17, 4  ;;  %p4198_p12 = scmp.ne.s32.totalorder %s4496_s5, %s4197_s21  ;;  %s81_s18 = int_to_ptr.vmem [resolvable:$true] %s80_s18 }
  0x5a   :  { %p4201_p13 = scmp.lt.u32.totalorder %s4197_s21, %s4496_s5 }
  0x5c   :  { %p4203_p0 = pnand %p4201_p13, %p4198_p12 }
  0x5e   :  { %4206 = shalt.err (!%p4203_p0)
}
  0x5f   :  { %s4207_s0 = scalar_lea.vmem %s81_s18, 1024  ;;  %p4212_p2 = scmp.lt.s32.totalorder %s81_s18, %s81_s18 }
  0x60   :  { %p4208_p1 = scmp.ne.s32.totalorder %s81_s18, %s4207_s0  ;;  %p4213_p3 = scmp.lt.s32.totalorder %s4207_s0, %s4207_s0 }
  0x62   :  { %p4214_p4 = por %p4213_p3, %p4212_p2 }
  0x64   :  { %p4215_p5 = pnand %p4214_p4, %p4208_p1 }
  0x66   :  { %4218 = shalt.err (!%p4215_p5)
}
  0x67   :  { %86 = dma.hbm_to_vmem [thread:$0]  %s4496_s5, 1024, %s81_s18, [#allocation12], %s4262_s2, %s4262_s2, %s4263_s8  }
  0x68   :  { %4241 = dma.done.wait [#allocation3], 64  }
  0x69   :  { %4242 = vsyncadd [#allocation3], 4294967232 }
  0x6a   :  { %4243 = dma.done.wait [#allocation6], 34816  }
  0x6b   :  { %4244 = vsyncadd [#allocation6], 4294932480 }
  0x6c   :  { %4245 = dma.done.wait [#allocation9], 10240  }
  0x6d   :  { %4246 = vsyncadd [#allocation9], 4294957056 }
  0x6e   :  { %4247 = dma.done.wait [#allocation12], 1024  }
  0x6f   :  { %4248 = vsyncadd [#allocation12], 4294966272  ;;  %v4265_v0 = vmov 0   ;;  %v109_v1 = vld [vmem:[#allocation5] sm:$0xff]  ;;  %v110_v8 = vld [vmem:[#allocation5 + $0x8] sm:$0xff]  ;;  %vm247_vm0 = vcmask 261120  }
  0x70   :  { %283 = vmatprep.mubr.bf16.mxu1 %v4265_v0  ;;  %v113_v2 = vld [vmem:[#allocation5 + $0x20] sm:$0xff]  ;;  %v114_v9 = vld [vmem:[#allocation5 + $0x28] sm:$0xff]  ;;  %v4389_v15 = vld [vmem:[#allocation2] sm:$0xf]  ;;  %vm4267_vm1 = vmmov 0   ;;  %s4268_s13 = smov [#allocation13]  }
  0x71   :  { %v117_v3 = vld [vmem:[#allocation5 + $0x40] sm:$0xff]  ;;  %v3115_v4 = vcombine.high %v109_v1, %v113_v2  ;;  %v3114_v5 = vcombine.low %v109_v1, %v113_v2  ;;  %v3117_v11 = vcombine.high %v110_v8, %v114_v9  ;;  %v118_v12 = vld [vmem:[#allocation5 + $0x48] sm:$0xff]  ;;  %v3116_v16 = vcombine.low %v110_v8, %v114_v9  ;;  %v111_v20 = vld [vmem:[#allocation5 + $0x10] sm:$0xff]  ;;  %s3102_s14 = sshll.u32 %s4268_s13, 4  ;;  %s3103_s14 = int_to_ptr.vmem [resolvable:$true] %s3102_s14 }
  0x72   :  { %v121_v6 = vld [vmem:[#allocation5 + $0x60] sm:$0xff]  ;;  %v122_v13 = vld [vmem:[#allocation5 + $0x68] sm:$0xff]  ;;  %v115_v21 = vld [vmem:[#allocation5 + $0x30] sm:$0xff]  ;;  %s4219_s15 = scalar_lea.vmem %s3103_s14, 128  ;;  %p4224_p7 = scmp.lt.s32.totalorder %s3103_s14, %s3103_s14 }
  0x73   :  { %v3123_v7 = vcombine.high %v117_v3, %v121_v6  ;;  %251 = vmatprep.subr.bf16.mxu1 %v3115_v4  ;;  %v3122_v10 = vcombine.low %v117_v3, %v121_v6  ;;  %v3583_v14 = vld [vmem:[#allocation7 + $0x4] ss:$16 sps:$4 sm:$0xff]   ;;  %v3588_v17 = vld [vmem:[#allocation7] ss:$16 sps:$4 sm:$0xff]   ;;  %v3125_v18 = vcombine.high %v118_v12, %v122_v13  ;;  %v3124_v24 = vcombine.low %v118_v12, %v122_v13  ;;  %v112_v32 = vld [vmem:[#allocation5 + $0x18] sm:$0xff]  ;;  %p4220_p6 = scmp.ne.s32.totalorder %s3103_s14, %s4219_s15  ;;  %p4225_p8 = scmp.lt.s32.totalorder %s4219_s15, %s4219_s15 }
  0x74   :  { %252 = vmatpush1.bf16.msra.mxu1 %v3114_v5  ;;  %1989 = vmatprep.subr.bf16.mxu0 %v3583_v14  ;;  %v3589_v19 = vld [vmem:[#allocation7 + $0x24] ss:$16 sps:$4 sm:$0xff]   ;;  %v3594_v22 = vld [vmem:[#allocation7 + $0x20] ss:$16 sps:$4 sm:$0xff]   ;;  %v3119_v25 = vcombine.high %v111_v20, %v115_v21  ;;  %v3118_v30 = vcombine.low %v111_v20, %v115_v21  ;;  %v116_v33 = vld [vmem:[#allocation5 + $0x38] sm:$0xff] }
  0x75   :  { %253 = vmatprep.subr.bf16.mxu1 %v3123_v7  ;;  %1990 = vmatpush1.bf16.msra.mxu0 %v3588_v17  ;;  %v3595_v23 = vld [vmem:[#allocation7 + $0x44] ss:$16 sps:$4 sm:$0xff]   ;;  %v3600_v28 = vld [vmem:[#allocation7 + $0x40] ss:$16 sps:$4 sm:$0xff]   ;;  %v3121_v37 = vcombine.high %v112_v32, %v116_v33  ;;  %v120_v38 = vld [vmem:[#allocation5 + $0x58] sm:$0xff]  ;;  %v3120_v42 = vcombine.low %v112_v32, %v116_v33  ;;  %p4226_p9 = por %p4225_p8, %p4224_p7 }
  0x76   :  { %1991 = vmatprep.subr.bf16.mxu0 %v3589_v19  ;;  %v119_v26 = vld [vmem:[#allocation5 + $0x50] sm:$0xff]  ;;  %v124_v39 = vld [vmem:[#allocation5 + $0x78] sm:$0xff] }
  0x77   :  { %v123_v27 = vld [vmem:[#allocation5 + $0x70] sm:$0xff]  ;;  %v3129_v43 = vcombine.high %v120_v38, %v124_v39  ;;  %v3128_v46 = vcombine.low %v120_v38, %v124_v39  ;;  %v3587_v47 = vld [vmem:[#allocation7 + $0xc] ss:$16 sps:$4 sm:$0xff]   ;;  %v3585_v50 = vld [vmem:[#allocation7 + $0x8] ss:$16 sps:$4 sm:$0xff]   ;;  %p4227_p10 = pnand %p4226_p9, %p4220_p6 }
  0x78   :  { %254 = vmatpush1.bf16.msra.mxu1 %v3122_v10  ;;  %v3601_v29 = vld [vmem:[#allocation7 + $0x64] ss:$16 sps:$4 sm:$0xff]   ;;  %v3127_v31 = vcombine.high %v119_v26, %v123_v27  ;;  %v3606_v34 = vld [vmem:[#allocation7 + $0x60] ss:$16 sps:$4 sm:$0xff]   ;;  %v3126_v36 = vcombine.low %v119_v26, %v123_v27  ;;  %v3593_v51 = vld [vmem:[#allocation7 + $0x2c] ss:$16 sps:$4 sm:$0xff]  }
  0x79   :  { %292 = vmatprep.subr.bf16.mxu1 %v3117_v11  ;;  %1992 = vmatpush1.bf16.msra.mxu0 %v3594_v22  ;;  %v3607_v35 = vld [vmem:[#allocation7 + $0x84] ss:$16 sps:$4 sm:$0xff]   ;;  %v3612_v40 = vld [vmem:[#allocation7 + $0x80] ss:$16 sps:$4 sm:$0xff]   ;;  %v3591_v54 = vld [vmem:[#allocation7 + $0x28] ss:$16 sps:$4 sm:$0xff]  }
  0x7a   :  { %1993 = vmatprep.subr.bf16.mxu0 %v3595_v23  ;;  %v3613_v41 = vld [vmem:[#allocation7 + $0xa4] ss:$16 sps:$4 sm:$0xff]   ;;  %v3618_v44 = vld [vmem:[#allocation7 + $0xa0] ss:$16 sps:$4 sm:$0xff]   ;;  %v3599_v55 = vld [vmem:[#allocation7 + $0x4c] ss:$16 sps:$4 sm:$0xff]  }
  0x7b   :  { %3130 = vmatmul.mubr.msk.bf16.vlgmr.msra.gmra.mrb[0].mxu1 %vm247_vm0, %v4389_v15  ;;  %v3619_v45 = vld [vmem:[#allocation7 + $0xc4] ss:$16 sps:$4 sm:$0xff]   ;;  %v3624_v48 = vld [vmem:[#allocation7 + $0xc0] ss:$16 sps:$4 sm:$0xff]   ;;  %v3597_v58 = vld [vmem:[#allocation7 + $0x48] ss:$16 sps:$4 sm:$0xff]  }
  0x7c   :  { %293 = vmatpush1.bf16.msra.mxu1 %v3116_v16  ;;  %324 = vmatprep.mubr.bf16.mxu1 %v4265_v0  ;;  %v3625_v49 = vld [vmem:[#allocation7 + $0xe4] ss:$16 sps:$4 sm:$0xff]   ;;  %v3630_v52 = vld [vmem:[#allocation7 + $0xe0] ss:$16 sps:$4 sm:$0xff]   ;;  %v3605_v59 = vld [vmem:[#allocation7 + $0x6c] ss:$16 sps:$4 sm:$0xff]  }
  0x7d   :  { %294 = vmatprep.subr.bf16.mxu1 %v3125_v18  ;;  %1994 = vmatpush1.bf16.msra.mxu0 %v3600_v28  ;;  %v3631_v53 = vld [vmem:[#allocation7 + $0x104] ss:$16 sps:$4 sm:$0xff]   ;;  %v3636_v56 = vld [vmem:[#allocation7 + $0x100] ss:$16 sps:$4 sm:$0xff]   ;;  %v3603_v60 = vld [vmem:[#allocation7 + $0x68] ss:$16 sps:$4 sm:$0xff]  }
  0x7e   :  { %1995 = vmatprep.subr.bf16.mxu0 %v3601_v29  ;;  %v3637_v57 = vld [vmem:[#allocation7 + $0x124] ss:$16 sps:$4 sm:$0xff]   ;;  %v3642_v61 = vld [vmem:[#allocation7 + $0x120] ss:$16 sps:$4 sm:$0xff]   ;;  %v3611_v62 = vld [vmem:[#allocation7 + $0x8c] ss:$16 sps:$4 sm:$0xff]  }
  0x7f   :  { %v3643_v63 = vld [vmem:[#allocation7 + $0x144] ss:$16 sps:$4 sm:$0xff]   ;;  %v3609_v2 = vld [vmem:[#allocation7 + $0x88] ss:$16 sps:$4 sm:$0xff]   ;;  %v3617_v3 = vld [vmem:[#allocation7 + $0xac] ss:$16 sps:$4 sm:$0xff]  }
  0x80   :  { %295 = vmatpush1.bf16.msra.mxu1 %v3124_v24  ;;  %v3649_v1 = vld [vmem:[#allocation7 + $0x164] ss:$16 sps:$4 sm:$0xff]   ;;  %v3654_v4 = vld [vmem:[#allocation7 + $0x160] ss:$16 sps:$4 sm:$0xff]   ;;  %v3615_v6 = vld [vmem:[#allocation7 + $0xa8] ss:$16 sps:$4 sm:$0xff]  }
  0x81   :  { %333 = vmatprep.subr.bf16.mxu1 %v3119_v25  ;;  %1996 = vmatpush1.bf16.msra.mxu0 %v3606_v34  ;;  %v3655_v5 = vld [vmem:[#allocation7 + $0x184] ss:$16 sps:$4 sm:$0xff]   ;;  %v3623_v7 = vld [vmem:[#allocation7 + $0xcc] ss:$16 sps:$4 sm:$0xff]   ;;  %v3660_v8 = vld [vmem:[#allocation7 + $0x180] ss:$16 sps:$4 sm:$0xff]  }
  0x82   :  { %1997 = vmatprep.subr.bf16.mxu0 %v3607_v35  ;;  %v3661_v9 = vld [vmem:[#allocation7 + $0x1a4] ss:$16 sps:$4 sm:$0xff]   ;;  %v3621_v10 = vld [vmem:[#allocation7 + $0xc8] ss:$16 sps:$4 sm:$0xff]   ;;  %v3629_v11 = vld [vmem:[#allocation7 + $0xec] ss:$16 sps:$4 sm:$0xff]  }
  0x83   :  { %3131 = vmatmul.mubr.msk.bf16.vlgmr.msra.gmra.mrb[4].mxu1 %vm247_vm0, %v4389_v15  ;;  %v3666_v12 = vld [vmem:[#allocation7 + $0x1a0] ss:$16 sps:$4 sm:$0xff]   ;;  %v3627_v13 = vld [vmem:[#allocation7 + $0xe8] ss:$16 sps:$4 sm:$0xff]   ;;  %v3635_v14 = vld [vmem:[#allocation7 + $0x10c] ss:$16 sps:$4 sm:$0xff]  }
  0x84   :  { %334 = vmatpush1.bf16.msra.mxu1 %v3118_v30  ;;  %365 = vmatprep.mubr.bf16.mxu1 %v4265_v0  ;;  %v3641_v16 = vld [vmem:[#allocation7 + $0x12c] ss:$16 sps:$4 sm:$0xff]   ;;  %v3639_v17 = vld [vmem:[#allocation7 + $0x128] ss:$16 sps:$4 sm:$0xff]   ;;  %v3667_v26 = vld [vmem:[#allocation7 + $0x1c4] ss:$16 sps:$4 sm:$0xff]  }
  0x85   :  { %335 = vmatprep.subr.bf16.mxu1 %v3127_v31  ;;  %1998 = vmatpush1.bf16.msra.mxu0 %v3612_v40  ;;  %v3647_v18 = vld [vmem:[#allocation7 + $0x14c] ss:$16 sps:$4 sm:$0xff]   ;;  %v3645_v19 = vld [vmem:[#allocation7 + $0x148] ss:$16 sps:$4 sm:$0xff]   ;;  %v3672_v29 = vld [vmem:[#allocation7 + $0x1c0] ss:$16 sps:$4 sm:$0xff]  }
  0x86   :  { %1999 = vmatprep.subr.bf16.mxu0 %v3613_v41  ;;  %v3653_v20 = vld [vmem:[#allocation7 + $0x16c] ss:$16 sps:$4 sm:$0xff]   ;;  %v3651_v21 = vld [vmem:[#allocation7 + $0x168] ss:$16 sps:$4 sm:$0xff]   ;;  %v3673_v30 = vld [vmem:[#allocation7 + $0x1e4] ss:$16 sps:$4 sm:$0xff]  }
  0x87   :  { %v3659_v22 = vld [vmem:[#allocation7 + $0x18c] ss:$16 sps:$4 sm:$0xff]   ;;  %v3657_v23 = vld [vmem:[#allocation7 + $0x188] ss:$16 sps:$4 sm:$0xff]   ;;  %v3678_v33 = vld [vmem:[#allocation7 + $0x1e0] ss:$16 sps:$4 sm:$0xff]  }
  0x88   :  { %336 = vmatpush1.bf16.msra.mxu1 %v3126_v36  ;;  %v3665_v24 = vld [vmem:[#allocation7 + $0x1ac] ss:$16 sps:$4 sm:$0xff]   ;;  %v3663_v25 = vld [vmem:[#allocation7 + $0x1a8] ss:$16 sps:$4 sm:$0xff]   ;;  %v3681_v34 = vld [vmem:[#allocation7 + $0x204] ss:$16 sps:$4 sm:$0xff]   ;;  %v127_v36 = vlaneseq }
  0x89   :  { %374 = vmatprep.subr.bf16.mxu1 %v3121_v37  ;;  %2000 = vmatpush1.bf16.msra.mxu0 %v3618_v44  ;;  %v3671_v27 = vld [vmem:[#allocation7 + $0x1cc] ss:$16 sps:$4 sm:$0xff]   ;;  %v3669_v28 = vld [vmem:[#allocation7 + $0x1c8] ss:$16 sps:$4 sm:$0xff]  }
  0x8a   :  { %2001 = vmatprep.subr.bf16.mxu0 %v3619_v45  ;;  %v3677_v31 = vld [vmem:[#allocation7 + $0x1ec] ss:$16 sps:$4 sm:$0xff]   ;;  %v3675_v32 = vld [vmem:[#allocation7 + $0x1e8] ss:$16 sps:$4 sm:$0xff]   ;;  %v4402_v37 = vshrl.u32 %v127_v36, 7 }
  0x8b   :  { %3132 = vmatmul.mubr.msk.bf16.vlgmr.msra.gmra.mrb[8].mxu1 %vm247_vm0, %v4389_v15  ;;  %v3684_v35 = vld [vmem:[#allocation7 + $0x20c] ss:$16 sps:$4 sm:$0xff]   ;;  %v3735_v36 = vld [vmem:[#allocation7 + $0x324] ss:$16 sps:$4 sm:$0xff]  }
  0x8c   :  { %375 = vmatpush1.bf16.msra.mxu1 %v3120_v42  ;;  %406 = vmatprep.mubr.bf16.mxu1 %v4265_v0  ;;  %v3648_v0 = vld [vmem:[#allocation7 + $0x140] ss:$16 sps:$4 sm:$0xff]   ;;  %v4405_v38 = vsub.s32 0, %v4402_v37  ;;  %v4413_v40 = vsub.s32 1, %v4402_v37 }
  0x8d   :  { %376 = vmatprep.subr.bf16.mxu1 %v3129_v43  ;;  %2002 = vmatpush1.bf16.msra.mxu0 %v3624_v48  ;;  %v4410_v39 = vld [vmem:[%s4497_s6] sm:$0xff]  ;;  %v141_v48 = vsub.s32 3, %v4402_v37 }
  0x8e   :  { %2003 = vmatprep.subr.bf16.mxu0 %v3625_v49  ;;  %v130_v41 = vrot.slane %v4410_v39, %v4405_v38  ;;  %v134_v42 = vrot.slane %v4410_v39, %v4413_v40 }
  0x90   :  { %377 = vmatpush1.bf16.msra.mxu1 %v3128_v46 }
  0x91   :  { %2153 = vmatprep.subr.bf16.mxu1 %v3587_v47  ;;  %2004 = vmatpush1.bf16.msra.mxu0 %v3630_v52 }
  0x92   :  { %2005 = vmatprep.subr.bf16.mxu0 %v3631_v53  ;;  %v3679_v53 = vld [vmem:[#allocation7 + $0x200] ss:$16 sps:$4 sm:$0xff]  }
  0x93   :  { %3133 = vmatmul.mubr.msk.bf16.vlgmr.msra.gmra.mrb[12].mxu1 %vm247_vm0, %v4389_v15  ;;  %v3633_v15 = vld [vmem:[#allocation7 + $0x108] ss:$16 sps:$4 sm:$0xff]  }
  0x94   :  { %2154 = vmatpush1.bf16.msra.mxu1 %v3585_v50 }
  0x95   :  { %2155 = vmatprep.subr.bf16.mxu1 %v3593_v51  ;;  %2006 = vmatpush1.bf16.msra.mxu0 %v3636_v56 }
  0x96   :  { %2007 = vmatprep.subr.bf16.mxu0 %v3637_v57  ;;  %v3687_v57 = vld [vmem:[#allocation7 + $0x224] ss:$16 sps:$4 sm:$0xff]  }
  0x98   :  { %2156 = vmatpush1.bf16.msra.mxu1 %v3591_v54  ;;  %v3682_v54 = vld [vmem:[#allocation7 + $0x208] ss:$16 sps:$4 sm:$0xff]  }
  0x99   :  { %2157 = vmatprep.subr.bf16.mxu1 %v3599_v55  ;;  %2008 = vmatpush1.bf16.msra.mxu0 %v3642_v61  ;;  %v142_v55 = vrot.slane %v4410_v39, %v141_v48  ;;  %v3685_v61 = vld [vmem:[#allocation7 + $0x220] ss:$16 sps:$4 sm:$0xff]  }
  0x9a   :  { %2009 = vmatprep.subr.bf16.mxu0 %v3643_v63 }
  0x9c   :  { %2158 = vmatpush1.bf16.msra.mxu1 %v3597_v58  ;;  %v3690_v58 = vld [vmem:[#allocation7 + $0x22c] ss:$16 sps:$4 sm:$0xff]  }
  0x9d   :  { %2159 = vmatprep.subr.bf16.mxu1 %v3605_v59  ;;  %2010 = vmatpush1.bf16.msra.mxu0 %v3648_v0 }
  0x9e   :  { %2011 = vmatprep.subr.bf16.mxu0 %v3649_v1  ;;  %v3693_v1 = vld [vmem:[#allocation7 + $0x244] ss:$16 sps:$4 sm:$0xff]  }
  0xa0   :  { %2160 = vmatpush1.bf16.msra.mxu1 %v3603_v60 }
  0xa1   :  { %2161 = vmatprep.subr.bf16.mxu1 %v3611_v62  ;;  %2012 = vmatpush1.bf16.msra.mxu0 %v3654_v4  ;;  %v3688_v62 = vld [vmem:[#allocation7 + $0x228] ss:$16 sps:$4 sm:$0xff]  }
  0xa2   :  { %2013 = vmatprep.subr.bf16.mxu0 %v3655_v5  ;;  %v3691_v5 = vld [vmem:[#allocation7 + $0x240] ss:$16 sps:$4 sm:$0xff]  }
  0xa4   :  { %2162 = vmatpush1.bf16.msra.mxu1 %v3609_v2  ;;  %v3696_v2 = vld [vmem:[#allocation7 + $0x24c] ss:$16 sps:$4 sm:$0xff]  }
  0xa5   :  { %2163 = vmatprep.subr.bf16.mxu1 %v3617_v3  ;;  %2014 = vmatpush1.bf16.msra.mxu0 %v3660_v8  ;;  %v3699_v8 = vld [vmem:[#allocation7 + $0x264] ss:$16 sps:$4 sm:$0xff]  }
  0xa6   :  { %2015 = vmatprep.subr.bf16.mxu0 %v3661_v9  ;;  %v3702_v9 = vld [vmem:[#allocation7 + $0x26c] ss:$16 sps:$4 sm:$0xff]  }
  0xa8   :  { %2164 = vmatpush1.bf16.msra.mxu1 %v3615_v6  ;;  %v3694_v6 = vld [vmem:[#allocation7 + $0x248] ss:$16 sps:$4 sm:$0xff]  }
  0xa9   :  { %2165 = vmatprep.subr.bf16.mxu1 %v3623_v7  ;;  %2016 = vmatpush1.bf16.msra.mxu0 %v3666_v12  ;;  %v3697_v12 = vld [vmem:[#allocation7 + $0x260] ss:$16 sps:$4 sm:$0xff]  }
  0xaa   :  { %2017 = vmatprep.subr.bf16.mxu0 %v3667_v26  ;;  %v3715_v26 = vld [vmem:[#allocation7 + $0x2c0] ss:$16 sps:$4 sm:$0xff]  }
  0xac   :  { %2166 = vmatpush1.bf16.msra.mxu1 %v3621_v10 }
  0xad   :  { %2167 = vmatprep.subr.bf16.mxu1 %v3629_v11  ;;  %2018 = vmatpush1.bf16.msra.mxu0 %v3672_v29  ;;  %v3726_v29 = vld [vmem:[#allocation7 + $0x2ec] ss:$16 sps:$4 sm:$0xff]  }
  0xae   :  { %2019 = vmatprep.subr.bf16.mxu0 %v3673_v30  ;;  %v3721_v30 = vld [vmem:[#allocation7 + $0x2e0] ss:$16 sps:$4 sm:$0xff]  }
  0xb0   :  { %2168 = vmatpush1.bf16.msra.mxu1 %v3627_v13  ;;  %v3700_v13 = vld [vmem:[#allocation7 + $0x268] ss:$16 sps:$4 sm:$0xff]  }
  0xb1   :  { %2169 = vmatprep.subr.bf16.mxu1 %v3635_v14  ;;  %2020 = vmatpush1.bf16.msra.mxu0 %v3678_v33  ;;  %v3732_v33 = vld [vmem:[#allocation7 + $0x30c] ss:$16 sps:$4 sm:$0xff]  }
  0xb2   :  { %2030 = vmatprep.subr.bf16.mxu0 %v3681_v34  ;;  %v3727_v34 = vld [vmem:[#allocation7 + $0x300] ss:$16 sps:$4 sm:$0xff]  }
  0xb4   :  { %2170 = vmatpush1.bf16.msra.mxu1 %v3633_v15  ;;  %v3705_v15 = vld [vmem:[#allocation7 + $0x284] ss:$16 sps:$4 sm:$0xff]  }
  0xb5   :  { %2171 = vmatprep.subr.bf16.mxu1 %v3641_v16  ;;  %v3708_v16 = vld [vmem:[#allocation7 + $0x28c] ss:$16 sps:$4 sm:$0xff]  }
  0xb8   :  { %2172 = vmatpush1.bf16.msra.mxu1 %v3639_v17 }
  0xb9   :  { %2173 = vmatprep.subr.bf16.mxu1 %v3647_v18  ;;  %v3703_v18 = vld [vmem:[#allocation7 + $0x280] ss:$16 sps:$4 sm:$0xff]  }
  0xbc   :  { %2174 = vmatpush1.bf16.msra.mxu1 %v3645_v19  ;;  %v3706_v19 = vld [vmem:[#allocation7 + $0x288] ss:$16 sps:$4 sm:$0xff]  }
  0xbd   :  { %2175 = vmatprep.subr.bf16.mxu1 %v3653_v20  ;;  %v3711_v20 = vld [vmem:[#allocation7 + $0x2a4] ss:$16 sps:$4 sm:$0xff]  }
  0xc0   :  { %2176 = vmatpush1.bf16.msra.mxu1 %v3651_v21  ;;  %v3714_v21 = vld [vmem:[#allocation7 + $0x2ac] ss:$16 sps:$4 sm:$0xff]  }
  0xc1   :  { %2177 = vmatprep.subr.bf16.mxu1 %v3659_v22  ;;  %v3709_v22 = vld [vmem:[#allocation7 + $0x2a0] ss:$16 sps:$4 sm:$0xff]  }
  0xc4   :  { %2178 = vmatpush1.bf16.msra.mxu1 %v3657_v23  ;;  %v3712_v23 = vld [vmem:[#allocation7 + $0x2a8] ss:$16 sps:$4 sm:$0xff]  }
  0xc5   :  { %2179 = vmatprep.subr.bf16.mxu1 %v3665_v24  ;;  %v3717_v24 = vld [vmem:[#allocation7 + $0x2c4] ss:$16 sps:$4 sm:$0xff]  }
  0xc8   :  { %2180 = vmatpush1.bf16.msra.mxu1 %v3663_v25  ;;  %v3720_v25 = vld [vmem:[#allocation7 + $0x2cc] ss:$16 sps:$4 sm:$0xff]  }
  0xc9   :  { %2181 = vmatprep.subr.bf16.mxu1 %v3671_v27  ;;  %v3718_v27 = vld [vmem:[#allocation7 + $0x2c8] ss:$16 sps:$4 sm:$0xff]  }
  0xcc   :  { %2182 = vmatpush1.bf16.msra.mxu1 %v3669_v28  ;;  %v3723_v28 = vld [vmem:[#allocation7 + $0x2e4] ss:$16 sps:$4 sm:$0xff]  }
  0xcd   :  { %2183 = vmatprep.subr.bf16.mxu1 %v3677_v31  ;;  %v3724_v31 = vld [vmem:[#allocation7 + $0x2e8] ss:$16 sps:$4 sm:$0xff]  }
  0xd0   :  { %2184 = vmatpush1.bf16.msra.mxu1 %v3675_v32  ;;  %v3729_v32 = vld [vmem:[#allocation7 + $0x304] ss:$16 sps:$4 sm:$0xff]  }
  0xd1   :  { %2194 = vmatprep.subr.bf16.mxu1 %v3684_v35  ;;  %v3730_v35 = vld [vmem:[#allocation7 + $0x308] ss:$16 sps:$4 sm:$0xff]  }
 0x14e   :  { %v285_v43 = vpop.f32.mrb[0].mxu1 }
 0x14f   :  { %v286_v44 = vadd.f32 %v285_v43, %v130_v41  ;;  %v287_v45 = vpop.f32.mrb[1].mxu1  ;;  %v3738_v41 = vld [vmem:[#allocation7 + $0x32c] ss:$16 sps:$4 sm:$0xff]   ;;  %v3736_v43 = vld [vmem:[#allocation7 + $0x328] ss:$16 sps:$4 sm:$0xff]  }
 0x150   :  { %v288_v46 = vadd.f32 %v287_v45, %v134_v42  ;;  %v289_v47 = vpop.f32.mrb[2].mxu1  ;;  %v3733_v42 = vld [vmem:[#allocation7 + $0x320] ss:$16 sps:$4 sm:$0xff]   ;;  %v3744_v45 = vld [vmem:[#allocation7 + $0x34c] ss:$16 sps:$4 sm:$0xff]  }
 0x151   :  { %v415_v49 = vmax.f32 %v286_v44, 0.0  ;;  %v290_v50 = vpop.f32.mrb[3].mxu1  ;;  %v3741_v44 = vld [vmem:[#allocation7 + $0x344] ss:$16 sps:$4 sm:$0xff]   ;;  %v3742_v47 = vld [vmem:[#allocation7 + $0x348] ss:$16 sps:$4 sm:$0xff]  }
 0x152   :  { %v416_v51 = vmax.f32 %v288_v46, 0.0  ;;  %v3739_v46 = vld [vmem:[#allocation7 + $0x340] ss:$16 sps:$4 sm:$0xff]   ;;  %v3750_v50 = vld [vmem:[#allocation7 + $0x36c] ss:$16 sps:$4 sm:$0xff]  }
 0x153   :  { %v423_v56 = vpack.c.bf16 %v415_v49, %v415_v49  ;;  %v3747_v49 = vld [vmem:[#allocation7 + $0x364] ss:$16 sps:$4 sm:$0xff]  }
 0x154   :  { %v424_v52 = vpack.c.bf16 %v416_v51, %v416_v51  ;;  %v3745_v51 = vld [vmem:[#allocation7 + $0x360] ss:$16 sps:$4 sm:$0xff]  }
 0x156   :  { %2021 = vmatprep.mubr.bf16.mxu0 %v424_v52  ;;  %2185 = vmatprep.mubr.bf16.mxu1 %v424_v52  ;;  %v4423_v59 = vpop.f32.mrb[4].mxu1  ;;  %v3748_v52 = vld [vmem:[#allocation7 + $0x368] ss:$16 sps:$4 sm:$0xff]  }
 0x157   :  { %2022 = vmatmul.mubr.bf16.vlgmr.msra.gmra.mrb[0].mxu0 %v423_v56  ;;  %2186 = vmatmul.mubr.bf16.vlgmr.msra.gmra.mrb[16].mxu1 %v423_v56  ;;  %v328_v60 = vpop.f32.mrb[5].mxu1  ;;  %v3751_v56 = vld [vmem:[#allocation7 + $0x380] ss:$16 sps:$4 sm:$0xff]  }
 0x158   :  { %2031 = vmatpush1.bf16.msra.mxu0 %v3679_v53  ;;  %2195 = vmatpush1.bf16.msra.mxu1 %v3682_v54  ;;  %v329_v63 = vadd.f32 %v328_v60, %v142_v55  ;;  %v330_v0 = vpop.f32.mrb[6].mxu1  ;;  %v3753_v53 = vld [vmem:[#allocation7 + $0x384] ss:$16 sps:$4 sm:$0xff]   ;;  %v3756_v54 = vld [vmem:[#allocation7 + $0x38c] ss:$16 sps:$4 sm:$0xff]   ;;  %v137_v55 = vsub.s32 2, %v4402_v37 }
 0x159   :  { %2032 = vmatprep.subr.bf16.mxu0 %v3687_v57  ;;  %2196 = vmatprep.subr.bf16.mxu1 %v3690_v58  ;;  %v331_v3 = vpop.f32.mrb[7].mxu1  ;;  %v3754_v57 = vld [vmem:[#allocation7 + $0x388] ss:$16 sps:$4 sm:$0xff]   ;;  %v3759_v58 = vld [vmem:[#allocation7 + $0x3a4] ss:$16 sps:$4 sm:$0xff]  }
 0x15a   :  { %v418_v4 = vmax.f32 %v329_v63, 0.0  ;;  %v3762_v60 = vld [vmem:[#allocation7 + $0x3ac] ss:$16 sps:$4 sm:$0xff]   ;;  %v3757_v63 = vld [vmem:[#allocation7 + $0x3a0] ss:$16 sps:$4 sm:$0xff]  }
 0x15b   :  { %v3760_v0 = vld [vmem:[#allocation7 + $0x3a8] ss:$16 sps:$4 sm:$0xff]   ;;  %v3768_v3 = vld [vmem:[#allocation7 + $0x3cc] ss:$16 sps:$4 sm:$0xff]  }
 0x15c   :  { %2033 = vmatpush1.bf16.msra.mxu0 %v3685_v61  ;;  %2197 = vmatpush1.bf16.msra.mxu1 %v3688_v62  ;;  %v426_v7 = vpack.c.bf16 %v418_v4, %v418_v4  ;;  %v149_v61 = vsub.s32 5, %v4402_v37  ;;  %v138_v62 = vrot.slane %v4410_v39, %v137_v55 }
 0x15d   :  { %2034 = vmatprep.subr.bf16.mxu0 %v3693_v1  ;;  %2198 = vmatprep.subr.bf16.mxu1 %v3696_v2  ;;  %v3765_v2 = vld [vmem:[#allocation7 + $0x3c4] ss:$16 sps:$4 sm:$0xff]  }
 0x15e   :  { %2062 = vmatprep.mubr.bf16.mxu0 %v426_v7  ;;  %2226 = vmatprep.mubr.bf16.mxu1 %v426_v7  ;;  %v4425_v10 = vpop.f32.mrb[8].mxu1  ;;  %v327_v7 = vadd.f32 %v4423_v59, %v138_v62  ;;  %v3780_v59 = vld [vmem:[#allocation7 + $0x40c] ss:$16 sps:$4 sm:$0xff]   ;;  %v3826_v62 = vld [vmem:[#allocation7 + $0x508] ss:$16 sps:$4 sm:$0xff]  }
 0x15f   :  { %v4427_v11 = vpop.f32.mrb[9].mxu1 }
 0x160   :  { %2035 = vmatpush1.bf16.msra.mxu0 %v3691_v5  ;;  %2199 = vmatpush1.bf16.msra.mxu1 %v3694_v6  ;;  %v371_v14 = vpop.f32.mrb[10].mxu1  ;;  %v150_v5 = vrot.slane %v4410_v39, %v149_v61  ;;  %v3823_v61 = vld [vmem:[#allocation7 + $0x500] ss:$16 sps:$4 sm:$0xff]  }
 0x161   :  { %2036 = vmatprep.subr.bf16.mxu0 %v3699_v8  ;;  %2200 = vmatprep.subr.bf16.mxu1 %v3702_v9  ;;  %v372_v17 = vpop.f32.mrb[11].mxu1  ;;  %v3763_v9 = vld [vmem:[#allocation7 + $0x3c0] ss:$16 sps:$4 sm:$0xff]   ;;  %v3774_v14 = vld [vmem:[#allocation7 + $0x3ec] ss:$16 sps:$4 sm:$0xff]  }
 0x162   :  { %v3769_v17 = vld [vmem:[#allocation7 + $0x3e0] ss:$16 sps:$4 sm:$0xff]  }
 0x164   :  { %2037 = vmatpush1.bf16.msra.mxu0 %v3697_v12  ;;  %2201 = vmatpush1.bf16.msra.mxu1 %v3700_v13  ;;  %v3766_v12 = vld [vmem:[#allocation7 + $0x3c8] ss:$16 sps:$4 sm:$0xff]   ;;  %v3771_v13 = vld [vmem:[#allocation7 + $0x3e4] ss:$16 sps:$4 sm:$0xff]  }
 0x165   :  { %2038 = vmatprep.subr.bf16.mxu0 %v3705_v15  ;;  %2202 = vmatprep.subr.bf16.mxu1 %v3708_v16  ;;  %v370_v15 = vadd.f32 %v4427_v11, %v150_v5  ;;  %v417_v16 = vmax.f32 %v327_v7, 0.0  ;;  %v3837_v5 = vld [vmem:[#allocation7 + $0x544] ss:$16 sps:$4 sm:$0xff]   ;;  %v3835_v7 = vld [vmem:[#allocation7 + $0x540] ss:$16 sps:$4 sm:$0xff]  }
 0x166   :  { %v4434_v1 = vpop.f32.mrb[12].mxu1 }
 0x167   :  { %v4436_v4 = vpop.f32.mrb[13].mxu1 }
 0x168   :  { %2039 = vmatpush1.bf16.msra.mxu0 %v3703_v18  ;;  %2203 = vmatpush1.bf16.msra.mxu1 %v3706_v19  ;;  %v412_v6 = vpop.f32.mrb[14].mxu1  ;;  %v3772_v18 = vld [vmem:[#allocation7 + $0x3e8] ss:$16 sps:$4 sm:$0xff]   ;;  %v3777_v19 = vld [vmem:[#allocation7 + $0x404] ss:$16 sps:$4 sm:$0xff]  }
 0x169   :  { %2040 = vmatprep.subr.bf16.mxu0 %v3711_v20  ;;  %2204 = vmatprep.subr.bf16.mxu1 %v3714_v21  ;;  %v413_v8 = vpop.f32.mrb[15].mxu1  ;;  %v420_v20 = vmax.f32 %v370_v15, 0.0  ;;  %v425_v21 = vpack.c.bf16 %v417_v16, %v417_v16  ;;  %v3840_v6 = vld [vmem:[#allocation7 + $0x54c] ss:$16 sps:$4 sm:$0xff]   ;;  %v3849_v15 = vld [vmem:[#allocation7 + $0x584] ss:$16 sps:$4 sm:$0xff]  }
 0x16a   :  { %v3838_v8 = vld [vmem:[#allocation7 + $0x548] ss:$16 sps:$4 sm:$0xff]   ;;  %v3852_v16 = vld [vmem:[#allocation7 + $0x58c] ss:$16 sps:$4 sm:$0xff]  }
 0x16b   :  { %v428_v11 = vpack.c.bf16 %v420_v20, %v420_v20  ;;  %v3858_v20 = vld [vmem:[#allocation7 + $0x5ac] ss:$16 sps:$4 sm:$0xff]  }
 0x16c   :  { %2041 = vmatpush1.bf16.msra.mxu0 %v3709_v22  ;;  %2205 = vmatpush1.bf16.msra.mxu1 %v3712_v23  ;;  %v3775_v22 = vld [vmem:[#allocation7 + $0x400] ss:$16 sps:$4 sm:$0xff]   ;;  %v3778_v23 = vld [vmem:[#allocation7 + $0x408] ss:$16 sps:$4 sm:$0xff]  }
 0x16d   :  { %2042 = vmatprep.subr.bf16.mxu0 %v3717_v24  ;;  %2206 = vmatprep.subr.bf16.mxu1 %v3720_v25  ;;  %v3783_v24 = vld [vmem:[#allocation7 + $0x424] ss:$16 sps:$4 sm:$0xff]   ;;  %v3786_v25 = vld [vmem:[#allocation7 + $0x42c] ss:$16 sps:$4 sm:$0xff]  }
 0x170   :  { %2043 = vmatpush1.bf16.msra.mxu0 %v3715_v26  ;;  %2207 = vmatpush1.bf16.msra.mxu1 %v3718_v27  ;;  %v3781_v26 = vld [vmem:[#allocation7 + $0x420] ss:$16 sps:$4 sm:$0xff]   ;;  %v3784_v27 = vld [vmem:[#allocation7 + $0x428] ss:$16 sps:$4 sm:$0xff]  }
 0x171   :  { %2044 = vmatprep.subr.bf16.mxu0 %v3723_v28  ;;  %2208 = vmatprep.subr.bf16.mxu1 %v3726_v29  ;;  %v3789_v28 = vld [vmem:[#allocation7 + $0x444] ss:$16 sps:$4 sm:$0xff]   ;;  %v3792_v29 = vld [vmem:[#allocation7 + $0x44c] ss:$16 sps:$4 sm:$0xff]  }
 0x174   :  { %2045 = vmatpush1.bf16.msra.mxu0 %v3721_v30  ;;  %2209 = vmatpush1.bf16.msra.mxu1 %v3724_v31  ;;  %v3787_v30 = vld [vmem:[#allocation7 + $0x440] ss:$16 sps:$4 sm:$0xff]   ;;  %v3790_v31 = vld [vmem:[#allocation7 + $0x448] ss:$16 sps:$4 sm:$0xff]  }
 0x175   :  { %2046 = vmatprep.subr.bf16.mxu0 %v3729_v32  ;;  %2210 = vmatprep.subr.bf16.mxu1 %v3732_v33  ;;  %v3795_v32 = vld [vmem:[#allocation7 + $0x464] ss:$16 sps:$4 sm:$0xff]   ;;  %v3798_v33 = vld [vmem:[#allocation7 + $0x46c] ss:$16 sps:$4 sm:$0xff]  }
 0x178   :  { %2047 = vmatpush1.bf16.msra.mxu0 %v3727_v34  ;;  %2211 = vmatpush1.bf16.msra.mxu1 %v3730_v35  ;;  %v3793_v34 = vld [vmem:[#allocation7 + $0x460] ss:$16 sps:$4 sm:$0xff]   ;;  %v3796_v35 = vld [vmem:[#allocation7 + $0x468] ss:$16 sps:$4 sm:$0xff]  }
 0x179   :  { %2048 = vmatprep.subr.bf16.mxu0 %v3735_v36  ;;  %2212 = vmatprep.subr.bf16.mxu1 %v3738_v41  ;;  %v3801_v36 = vld [vmem:[#allocation7 + $0x484] ss:$16 sps:$4 sm:$0xff]   ;;  %v3804_v41 = vld [vmem:[#allocation7 + $0x48c] ss:$16 sps:$4 sm:$0xff]  }
 0x17c   :  { %2049 = vmatpush1.bf16.msra.mxu0 %v3733_v42  ;;  %2213 = vmatpush1.bf16.msra.mxu1 %v3736_v43  ;;  %v3799_v42 = vld [vmem:[#allocation7 + $0x480] ss:$16 sps:$4 sm:$0xff]   ;;  %v3802_v43 = vld [vmem:[#allocation7 + $0x488] ss:$16 sps:$4 sm:$0xff]  }
 0x17d   :  { %2050 = vmatprep.subr.bf16.mxu0 %v3741_v44  ;;  %2214 = vmatprep.subr.bf16.mxu1 %v3744_v45  ;;  %v3807_v44 = vld [vmem:[#allocation7 + $0x4a4] ss:$16 sps:$4 sm:$0xff]   ;;  %v3810_v45 = vld [vmem:[#allocation7 + $0x4ac] ss:$16 sps:$4 sm:$0xff]  }
 0x180   :  { %2051 = vmatpush1.bf16.msra.mxu0 %v3739_v46  ;;  %2215 = vmatpush1.bf16.msra.mxu1 %v3742_v47  ;;  %v3805_v46 = vld [vmem:[#allocation7 + $0x4a0] ss:$16 sps:$4 sm:$0xff]   ;;  %v3808_v47 = vld [vmem:[#allocation7 + $0x4a8] ss:$16 sps:$4 sm:$0xff]  }
 0x181   :  { %2052 = vmatprep.subr.bf16.mxu0 %v3747_v49  ;;  %2216 = vmatprep.subr.bf16.mxu1 %v3750_v50  ;;  %v3813_v49 = vld [vmem:[#allocation7 + $0x4c4] ss:$16 sps:$4 sm:$0xff]   ;;  %v3816_v50 = vld [vmem:[#allocation7 + $0x4cc] ss:$16 sps:$4 sm:$0xff]  }
 0x184   :  { %2053 = vmatpush1.bf16.msra.mxu0 %v3745_v51  ;;  %2217 = vmatpush1.bf16.msra.mxu1 %v3748_v52  ;;  %v3811_v51 = vld [vmem:[#allocation7 + $0x4c0] ss:$16 sps:$4 sm:$0xff]   ;;  %v3814_v52 = vld [vmem:[#allocation7 + $0x4c8] ss:$16 sps:$4 sm:$0xff]  }
 0x185   :  { %2054 = vmatprep.subr.bf16.mxu0 %v3753_v53  ;;  %2218 = vmatprep.subr.bf16.mxu1 %v3756_v54  ;;  %v3819_v53 = vld [vmem:[#allocation7 + $0x4e4] ss:$16 sps:$4 sm:$0xff]   ;;  %v3822_v54 = vld [vmem:[#allocation7 + $0x4ec] ss:$16 sps:$4 sm:$0xff]  }
 0x188   :  { %2055 = vmatpush1.bf16.msra.mxu0 %v3751_v56  ;;  %2219 = vmatpush1.bf16.msra.mxu1 %v3754_v57  ;;  %v3817_v56 = vld [vmem:[#allocation7 + $0x4e0] ss:$16 sps:$4 sm:$0xff]   ;;  %v3820_v57 = vld [vmem:[#allocation7 + $0x4e8] ss:$16 sps:$4 sm:$0xff]  }
 0x189   :  { %2056 = vmatprep.subr.bf16.mxu0 %v3759_v58  ;;  %2220 = vmatprep.subr.bf16.mxu1 %v3762_v60  ;;  %v3825_v58 = vld [vmem:[#allocation7 + $0x504] ss:$16 sps:$4 sm:$0xff]   ;;  %v3828_v60 = vld [vmem:[#allocation7 + $0x50c] ss:$16 sps:$4 sm:$0xff]  }
 0x18c   :  { %2057 = vmatpush1.bf16.msra.mxu0 %v3757_v63  ;;  %2221 = vmatpush1.bf16.msra.mxu1 %v3760_v0  ;;  %v3831_v63 = vld [vmem:[#allocation7 + $0x524] ss:$16 sps:$4 sm:$0xff]   ;;  %v3834_v0 = vld [vmem:[#allocation7 + $0x52c] ss:$16 sps:$4 sm:$0xff]  }
 0x18d   :  { %2058 = vmatprep.subr.bf16.mxu0 %v3765_v2  ;;  %2222 = vmatprep.subr.bf16.mxu1 %v3768_v3  ;;  %v3829_v2 = vld [vmem:[#allocation7 + $0x520] ss:$16 sps:$4 sm:$0xff]   ;;  %v3832_v3 = vld [vmem:[#allocation7 + $0x528] ss:$16 sps:$4 sm:$0xff]  }
 0x190   :  { %2059 = vmatpush1.bf16.msra.mxu0 %v3763_v9  ;;  %2223 = vmatpush1.bf16.msra.mxu1 %v3766_v12  ;;  %v3843_v9 = vld [vmem:[#allocation7 + $0x564] ss:$16 sps:$4 sm:$0xff]   ;;  %v3846_v12 = vld [vmem:[#allocation7 + $0x56c] ss:$16 sps:$4 sm:$0xff]  }
 0x191   :  { %2060 = vmatprep.subr.bf16.mxu0 %v3771_v13  ;;  %2224 = vmatprep.subr.bf16.mxu1 %v3774_v14  ;;  %v3841_v13 = vld [vmem:[#allocation7 + $0x560] ss:$16 sps:$4 sm:$0xff]   ;;  %v3844_v14 = vld [vmem:[#allocation7 + $0x568] ss:$16 sps:$4 sm:$0xff]  }
 0x194   :  { %2061 = vmatpush1.bf16.msra.mxu0 %v3769_v17  ;;  %2225 = vmatpush1.bf16.msra.mxu1 %v3772_v18  ;;  %v145_v17 = vsub.s32 4, %v4402_v37  ;;  %v3847_v18 = vld [vmem:[#allocation7 + $0x580] ss:$16 sps:$4 sm:$0xff]  }
 0x195   :  { %2071 = vmatprep.subr.bf16.mxu0 %v3777_v19  ;;  %2235 = vmatprep.subr.bf16.mxu1 %v3780_v59  ;;  %v3850_v19 = vld [vmem:[#allocation7 + $0x588] ss:$16 sps:$4 sm:$0xff]   ;;  %v3855_v59 = vld [vmem:[#allocation7 + $0x5a4] ss:$16 sps:$4 sm:$0xff]  }
 0x197   :  { %2063 = vmatmul.mubr.bf16.vlgmr.msra.gmra.mrb[0].mxu0 %v425_v21  ;;  %2227 = vmatmul.mubr.bf16.vlgmr.msra.gmra.mrb[16].mxu1 %v425_v21  ;;  %v157_v21 = vsub.s32 7, %v4402_v37 }
 0x198   :  { %2072 = vmatpush1.bf16.msra.mxu0 %v3775_v22  ;;  %2236 = vmatpush1.bf16.msra.mxu1 %v3778_v23  ;;  %v146_v22 = vrot.slane %v4410_v39, %v145_v17  ;;  %v3853_v23 = vld [vmem:[#allocation7 + $0x5a0] ss:$16 sps:$4 sm:$0xff]   ;;  %v3924_v17 = vld [vmem:[#allocation7 + $0x70c] ss:$16 sps:$4 sm:$0xff]  }
 0x199   :  { %2073 = vmatprep.subr.bf16.mxu0 %v3783_v24  ;;  %2237 = vmatprep.subr.bf16.mxu1 %v3786_v25  ;;  %v3856_v24 = vld [vmem:[#allocation7 + $0x5a8] ss:$16 sps:$4 sm:$0xff]   ;;  %v3861_v25 = vld [vmem:[#allocation7 + $0x5c4] ss:$16 sps:$4 sm:$0xff]  }
 0x19a   :  { %2103 = vmatprep.mubr.bf16.mxu0 %v428_v11  ;;  %2267 = vmatprep.mubr.bf16.mxu1 %v428_v11  ;;  %v3864_v11 = vld [vmem:[#allocation7 + $0x5cc] ss:$16 sps:$4 sm:$0xff]  }
 0x19c   :  { %2074 = vmatpush1.bf16.msra.mxu0 %v3781_v26  ;;  %2238 = vmatpush1.bf16.msra.mxu1 %v3784_v27  ;;  %v158_v26 = vrot.slane %v4410_v39, %v157_v21  ;;  %v368_v27 = vadd.f32 %v4425_v10, %v146_v22  ;;  %v3925_v21 = vld [vmem:[#allocation7 + $0x720] ss:$16 sps:$4 sm:$0xff]   ;;  %v3928_v22 = vld [vmem:[#allocation7 + $0x728] ss:$16 sps:$4 sm:$0xff]  }
 0x19d   :  { %2075 = vmatprep.subr.bf16.mxu0 %v3789_v28  ;;  %2239 = vmatprep.subr.bf16.mxu1 %v3792_v29  ;;  %v3859_v28 = vld [vmem:[#allocation7 + $0x5c0] ss:$16 sps:$4 sm:$0xff]   ;;  %v3862_v29 = vld [vmem:[#allocation7 + $0x5c8] ss:$16 sps:$4 sm:$0xff]  }
 0x1a0   :  { %2076 = vmatpush1.bf16.msra.mxu0 %v3787_v30  ;;  %2240 = vmatpush1.bf16.msra.mxu1 %v3790_v31  ;;  %v3867_v30 = vld [vmem:[#allocation7 + $0x5e4] ss:$16 sps:$4 sm:$0xff]   ;;  %v3870_v31 = vld [vmem:[#allocation7 + $0x5ec] ss:$16 sps:$4 sm:$0xff]  }
 0x1a1   :  { %2077 = vmatprep.subr.bf16.mxu0 %v3795_v32  ;;  %2241 = vmatprep.subr.bf16.mxu1 %v3798_v33  ;;  %v411_v32 = vadd.f32 %v4436_v4, %v158_v26  ;;  %v419_v33 = vmax.f32 %v368_v27, 0.0  ;;  %v3939_v26 = vld [vmem:[#allocation7 + $0x764] ss:$16 sps:$4 sm:$0xff]   ;;  %v3942_v27 = vld [vmem:[#allocation7 + $0x76c] ss:$16 sps:$4 sm:$0xff]  }
 0x1a3   :  { %v422_v10 = vmax.f32 %v411_v32, 0.0  ;;  %v3943_v32 = vld [vmem:[#allocation7 + $0x780] ss:$16 sps:$4 sm:$0xff]  }
 0x1a4   :  { %2078 = vmatpush1.bf16.msra.mxu0 %v3793_v34  ;;  %2242 = vmatpush1.bf16.msra.mxu1 %v3796_v35  ;;  %v3865_v34 = vld [vmem:[#allocation7 + $0x5e0] ss:$16 sps:$4 sm:$0xff]   ;;  %v3868_v35 = vld [vmem:[#allocation7 + $0x5e8] ss:$16 sps:$4 sm:$0xff]  }
 0x1a5   :  { %2079 = vmatprep.subr.bf16.mxu0 %v3801_v36  ;;  %2243 = vmatprep.subr.bf16.mxu1 %v3804_v41  ;;  %v3873_v36 = vld [vmem:[#allocation7 + $0x604] ss:$16 sps:$4 sm:$0xff]   ;;  %v3876_v41 = vld [vmem:[#allocation7 + $0x60c] ss:$16 sps:$4 sm:$0xff]   ;;  %v430_v4 = vpack.c.bf16 %v422_v10, %v422_v10  ;;  %v3952_v10 = vld [vmem:[#allocation7 + $0x7a8] ss:$16 sps:$4 sm:$0xff]  }
 0x1a8   :  { %2080 = vmatpush1.bf16.msra.mxu0 %v3799_v42  ;;  %2244 = vmatpush1.bf16.msra.mxu1 %v3802_v43  ;;  %v427_v42 = vpack.c.bf16 %v419_v33, %v419_v33  ;;  %v3871_v43 = vld [vmem:[#allocation7 + $0x600] ss:$16 sps:$4 sm:$0xff]   ;;  %v3946_v33 = vld [vmem:[#allocation7 + $0x788] ss:$16 sps:$4 sm:$0xff]  }
 0x1a9   :  { %2081 = vmatprep.subr.bf16.mxu0 %v3807_v44  ;;  %2245 = vmatprep.subr.bf16.mxu1 %v3810_v45  ;;  %v3874_v44 = vld [vmem:[#allocation7 + $0x608] ss:$16 sps:$4 sm:$0xff]   ;;  %v3879_v45 = vld [vmem:[#allocation7 + $0x624] ss:$16 sps:$4 sm:$0xff]  }
 0x1ac   :  { %2082 = vmatpush1.bf16.msra.mxu0 %v3805_v46  ;;  %2246 = vmatpush1.bf16.msra.mxu1 %v3808_v47  ;;  %v3882_v46 = vld [vmem:[#allocation7 + $0x62c] ss:$16 sps:$4 sm:$0xff]   ;;  %v3877_v47 = vld [vmem:[#allocation7 + $0x620] ss:$16 sps:$4 sm:$0xff]  }
 0x1ad   :  { %2083 = vmatprep.subr.bf16.mxu0 %v3813_v49  ;;  %2247 = vmatprep.subr.bf16.mxu1 %v3816_v50  ;;  %v3880_v49 = vld [vmem:[#allocation7 + $0x628] ss:$16 sps:$4 sm:$0xff]   ;;  %v3885_v50 = vld [vmem:[#allocation7 + $0x644] ss:$16 sps:$4 sm:$0xff]  }
 0x1b0   :  { %2084 = vmatpush1.bf16.msra.mxu0 %v3811_v51  ;;  %2248 = vmatpush1.bf16.msra.mxu1 %v3814_v52  ;;  %v3888_v51 = vld [vmem:[#allocation7 + $0x64c] ss:$16 sps:$4 sm:$0xff]   ;;  %v3883_v52 = vld [vmem:[#allocation7 + $0x640] ss:$16 sps:$4 sm:$0xff]  }
 0x1b1   :  { %2085 = vmatprep.subr.bf16.mxu0 %v3819_v53  ;;  %2249 = vmatprep.subr.bf16.mxu1 %v3822_v54  ;;  %v3886_v53 = vld [vmem:[#allocation7 + $0x648] ss:$16 sps:$4 sm:$0xff]   ;;  %v3891_v54 = vld [vmem:[#allocation7 + $0x664] ss:$16 sps:$4 sm:$0xff]  }
 0x1b4   :  { %2086 = vmatpush1.bf16.msra.mxu0 %v3817_v56  ;;  %2250 = vmatpush1.bf16.msra.mxu1 %v3820_v57  ;;  %v3894_v56 = vld [vmem:[#allocation7 + $0x66c] ss:$16 sps:$4 sm:$0xff]   ;;  %v3889_v57 = vld [vmem:[#allocation7 + $0x660] ss:$16 sps:$4 sm:$0xff]  }
 0x1b5   :  { %2087 = vmatprep.subr.bf16.mxu0 %v3825_v58  ;;  %2251 = vmatprep.subr.bf16.mxu1 %v3828_v60  ;;  %v3892_v58 = vld [vmem:[#allocation7 + $0x668] ss:$16 sps:$4 sm:$0xff]   ;;  %v3897_v60 = vld [vmem:[#allocation7 + $0x684] ss:$16 sps:$4 sm:$0xff]  }
 0x1b8   :  { %2088 = vmatpush1.bf16.msra.mxu0 %v3823_v61  ;;  %2252 = vmatpush1.bf16.msra.mxu1 %v3826_v62  ;;  %v3900_v61 = vld [vmem:[#allocation7 + $0x68c] ss:$16 sps:$4 sm:$0xff]   ;;  %v3895_v62 = vld [vmem:[#allocation7 + $0x680] ss:$16 sps:$4 sm:$0xff]  }
 0x1b9   :  { %2089 = vmatprep.subr.bf16.mxu0 %v3831_v63  ;;  %2253 = vmatprep.subr.bf16.mxu1 %v3834_v0  ;;  %v3898_v63 = vld [vmem:[#allocation7 + $0x688] ss:$16 sps:$4 sm:$0xff]   ;;  %v3903_v0 = vld [vmem:[#allocation7 + $0x6a4] ss:$16 sps:$4 sm:$0xff]  }
 0x1bc   :  { %2090 = vmatpush1.bf16.msra.mxu0 %v3829_v2  ;;  %2254 = vmatpush1.bf16.msra.mxu1 %v3832_v3  ;;  %v3906_v2 = vld [vmem:[#allocation7 + $0x6ac] ss:$16 sps:$4 sm:$0xff]   ;;  %v3901_v3 = vld [vmem:[#allocation7 + $0x6a0] ss:$16 sps:$4 sm:$0xff]  }
 0x1bd   :  { %2091 = vmatprep.subr.bf16.mxu0 %v3837_v5  ;;  %2255 = vmatprep.subr.bf16.mxu1 %v3840_v6  ;;  %v3904_v5 = vld [vmem:[#allocation7 + $0x6a8] ss:$16 sps:$4 sm:$0xff]   ;;  %v3909_v6 = vld [vmem:[#allocation7 + $0x6c4] ss:$16 sps:$4 sm:$0xff]  }
 0x1c0   :  { %2092 = vmatpush1.bf16.msra.mxu0 %v3835_v7  ;;  %2256 = vmatpush1.bf16.msra.mxu1 %v3838_v8  ;;  %v3912_v7 = vld [vmem:[#allocation7 + $0x6cc] ss:$16 sps:$4 sm:$0xff]   ;;  %v3907_v8 = vld [vmem:[#allocation7 + $0x6c0] ss:$16 sps:$4 sm:$0xff]  }
 0x1c1   :  { %2093 = vmatprep.subr.bf16.mxu0 %v3843_v9  ;;  %2257 = vmatprep.subr.bf16.mxu1 %v3846_v12  ;;  %v3910_v9 = vld [vmem:[#allocation7 + $0x6c8] ss:$16 sps:$4 sm:$0xff]   ;;  %v3915_v12 = vld [vmem:[#allocation7 + $0x6e4] ss:$16 sps:$4 sm:$0xff]  }
 0x1c4   :  { %2094 = vmatpush1.bf16.msra.mxu0 %v3841_v13  ;;  %2258 = vmatpush1.bf16.msra.mxu1 %v3844_v14  ;;  %v3918_v13 = vld [vmem:[#allocation7 + $0x6ec] ss:$16 sps:$4 sm:$0xff]   ;;  %v3913_v14 = vld [vmem:[#allocation7 + $0x6e0] ss:$16 sps:$4 sm:$0xff]  }
 0x1c5   :  { %2095 = vmatprep.subr.bf16.mxu0 %v3849_v15  ;;  %2259 = vmatprep.subr.bf16.mxu1 %v3852_v16  ;;  %v3916_v15 = vld [vmem:[#allocation7 + $0x6e8] ss:$16 sps:$4 sm:$0xff]   ;;  %v3921_v16 = vld [vmem:[#allocation7 + $0x704] ss:$16 sps:$4 sm:$0xff]  }
 0x1c8   :  { %2096 = vmatpush1.bf16.msra.mxu0 %v3847_v18  ;;  %2260 = vmatpush1.bf16.msra.mxu1 %v3850_v19  ;;  %v3919_v18 = vld [vmem:[#allocation7 + $0x700] ss:$16 sps:$4 sm:$0xff]   ;;  %v3922_v19 = vld [vmem:[#allocation7 + $0x708] ss:$16 sps:$4 sm:$0xff]  }
 0x1c9   :  { %2097 = vmatprep.subr.bf16.mxu0 %v3855_v59  ;;  %2261 = vmatprep.subr.bf16.mxu1 %v3858_v20  ;;  %v3927_v59 = vld [vmem:[#allocation7 + $0x724] ss:$16 sps:$4 sm:$0xff]   ;;  %v3930_v20 = vld [vmem:[#allocation7 + $0x72c] ss:$16 sps:$4 sm:$0xff]  }
 0x1cc   :  { %2098 = vmatpush1.bf16.msra.mxu0 %v3853_v23  ;;  %2262 = vmatpush1.bf16.msra.mxu1 %v3856_v24  ;;  %v3933_v23 = vld [vmem:[#allocation7 + $0x744] ss:$16 sps:$4 sm:$0xff]   ;;  %v3936_v24 = vld [vmem:[#allocation7 + $0x74c] ss:$16 sps:$4 sm:$0xff]  }
 0x1cd   :  { %2099 = vmatprep.subr.bf16.mxu0 %v3861_v25  ;;  %2263 = vmatprep.subr.bf16.mxu1 %v3864_v11  ;;  %v3931_v25 = vld [vmem:[#allocation7 + $0x740] ss:$16 sps:$4 sm:$0xff]   ;;  %v3934_v11 = vld [vmem:[#allocation7 + $0x748] ss:$16 sps:$4 sm:$0xff]  }
 0x1d0   :  { %2100 = vmatpush1.bf16.msra.mxu0 %v3859_v28  ;;  %2264 = vmatpush1.bf16.msra.mxu1 %v3862_v29  ;;  %v3937_v28 = vld [vmem:[#allocation7 + $0x760] ss:$16 sps:$4 sm:$0xff]   ;;  %v3940_v29 = vld [vmem:[#allocation7 + $0x768] ss:$16 sps:$4 sm:$0xff]  }
 0x1d1   :  { %2101 = vmatprep.subr.bf16.mxu0 %v3867_v30  ;;  %2265 = vmatprep.subr.bf16.mxu1 %v3870_v31  ;;  %v3945_v30 = vld [vmem:[#allocation7 + $0x784] ss:$16 sps:$4 sm:$0xff]   ;;  %v3948_v31 = vld [vmem:[#allocation7 + $0x78c] ss:$16 sps:$4 sm:$0xff]  }
 0x1d4   :  { %2102 = vmatpush1.bf16.msra.mxu0 %v3865_v34  ;;  %2266 = vmatpush1.bf16.msra.mxu1 %v3868_v35  ;;  %v153_v34 = vsub.s32 6, %v4402_v37  ;;  %v3951_v35 = vld [vmem:[#allocation7 + $0x7a4] ss:$16 sps:$4 sm:$0xff]   ;;  %v4077_v37 = vld [vmem:[#allocation10 + $0x78] sm:$0xff]  }
 0x1d5   :  { %2112 = vmatprep.subr.bf16.mxu0 %v3873_v36  ;;  %2276 = vmatprep.subr.bf16.mxu1 %v3876_v41  ;;  %v3954_v36 = vld [vmem:[#allocation7 + $0x7ac] ss:$16 sps:$4 sm:$0xff]   ;;  %v3949_v41 = vld [vmem:[#allocation7 + $0x7a0] ss:$16 sps:$4 sm:$0xff]  }
 0x1d7   :  { %2104 = vmatmul.mubr.bf16.vlgmr.msra.gmra.mrb[0].mxu0 %v427_v42  ;;  %2268 = vmatmul.mubr.bf16.vlgmr.msra.gmra.mrb[16].mxu1 %v427_v42  ;;  %v154_v42 = vrot.slane %v4410_v39, %v153_v34  ;;  %v3969_v39 = vld [vmem:[#allocation8 + $0x4] ss:$8 sps:$4 sm:$0xff]  }
 0x1d8   :  { %2113 = vmatpush1.bf16.msra.mxu0 %v3871_v43  ;;  %2277 = vmatpush1.bf16.msra.mxu1 %v3874_v44  ;;  %v3957_v43 = vld [vmem:[#allocation7 + $0x7c4] ss:$16 sps:$4 sm:$0xff]   ;;  %v3960_v44 = vld [vmem:[#allocation7 + $0x7cc] ss:$16 sps:$4 sm:$0xff]  }
 0x1d9   :  { %2114 = vmatprep.subr.bf16.mxu0 %v3879_v45  ;;  %2278 = vmatprep.subr.bf16.mxu1 %v3882_v46  ;;  %v3955_v45 = vld [vmem:[#allocation7 + $0x7c0] ss:$16 sps:$4 sm:$0xff]   ;;  %v3958_v46 = vld [vmem:[#allocation7 + $0x7c8] ss:$16 sps:$4 sm:$0xff]  }
 0x1da   :  { %2144 = vmatprep.mubr.bf16.mxu0 %v430_v4  ;;  %2308 = vmatprep.mubr.bf16.mxu1 %v430_v4  ;;  %v409_v4 = vadd.f32 %v4434_v1, %v154_v42  ;;  %v3970_v1 = vld [vmem:[#allocation8 + $0x10] ss:$8 sps:$4 sm:$0xff]   ;;  %v4072_v34 = vld [vmem:[#allocation10 + $0x20] sm:$0xff]  }
 0x1dc   :  { %2115 = vmatpush1.bf16.msra.mxu0 %v3877_v47  ;;  %2279 = vmatpush1.bf16.msra.mxu1 %v3880_v49  ;;  %v3963_v47 = vld [vmem:[#allocation7 + $0x7e4] ss:$16 sps:$4 sm:$0xff]   ;;  %v3966_v49 = vld [vmem:[#allocation7 + $0x7ec] ss:$16 sps:$4 sm:$0xff]  }
 0x1dd   :  { %2116 = vmatprep.subr.bf16.mxu0 %v3885_v50  ;;  %2280 = vmatprep.subr.bf16.mxu1 %v3888_v51  ;;  %v3961_v50 = vld [vmem:[#allocation7 + $0x7e0] ss:$16 sps:$4 sm:$0xff]   ;;  %v3964_v51 = vld [vmem:[#allocation7 + $0x7e8] ss:$16 sps:$4 sm:$0xff]  }
 0x1e0   :  { %2117 = vmatpush1.bf16.msra.mxu0 %v3883_v52  ;;  %2281 = vmatpush1.bf16.msra.mxu1 %v3886_v53  ;;  %v421_v52 = vmax.f32 %v409_v4, 0.0  ;;  %v3967_v53 = vld [vmem:[#allocation8] ss:$8 sps:$4 sm:$0xff]  }
 0x1e1   :  { %2118 = vmatprep.subr.bf16.mxu0 %v3891_v54  ;;  %2282 = vmatprep.subr.bf16.mxu1 %v3894_v56  ;;  %v3972_v56 = vld [vmem:[#allocation8 + $0x14] ss:$8 sps:$4 sm:$0xff]  }
 0x1e2   :  { %v429_v54 = vpack.c.bf16 %v421_v52, %v421_v52 }
 0x1e4   :  { %2119 = vmatpush1.bf16.msra.mxu0 %v3889_v57  ;;  %2283 = vmatpush1.bf16.msra.mxu1 %v3892_v58  ;;  %v3975_v57 = vld [vmem:[#allocation8 + $0x24] ss:$8 sps:$4 sm:$0xff]   ;;  %v3973_v58 = vld [vmem:[#allocation8 + $0x20] ss:$8 sps:$4 sm:$0xff]  }
 0x1e5   :  { %2120 = vmatprep.subr.bf16.mxu0 %v3897_v60  ;;  %2284 = vmatprep.subr.bf16.mxu1 %v3900_v61  ;;  %v3978_v60 = vld [vmem:[#allocation8 + $0x34] ss:$8 sps:$4 sm:$0xff]   ;;  %v3976_v61 = vld [vmem:[#allocation8 + $0x30] ss:$8 sps:$4 sm:$0xff]  }
 0x1e8   :  { %2121 = vmatpush1.bf16.msra.mxu0 %v3895_v62  ;;  %2285 = vmatpush1.bf16.msra.mxu1 %v3898_v63  ;;  %v3981_v62 = vld [vmem:[#allocation8 + $0x44] ss:$8 sps:$4 sm:$0xff]   ;;  %v3979_v63 = vld [vmem:[#allocation8 + $0x40] ss:$8 sps:$4 sm:$0xff]  }
 0x1e9   :  { %2122 = vmatprep.subr.bf16.mxu0 %v3903_v0  ;;  %2286 = vmatprep.subr.bf16.mxu1 %v3906_v2  ;;  %v3984_v0 = vld [vmem:[#allocation8 + $0x54] ss:$8 sps:$4 sm:$0xff]   ;;  %v3982_v2 = vld [vmem:[#allocation8 + $0x50] ss:$8 sps:$4 sm:$0xff]  }
 0x1ec   :  { %2123 = vmatpush1.bf16.msra.mxu0 %v3901_v3  ;;  %2287 = vmatpush1.bf16.msra.mxu1 %v3904_v5  ;;  %v3987_v3 = vld [vmem:[#allocation8 + $0x64] ss:$8 sps:$4 sm:$0xff]   ;;  %v3985_v5 = vld [vmem:[#allocation8 + $0x60] ss:$8 sps:$4 sm:$0xff]  }
 0x1ed   :  { %2124 = vmatprep.subr.bf16.mxu0 %v3909_v6  ;;  %2288 = vmatprep.subr.bf16.mxu1 %v3912_v7  ;;  %v3990_v6 = vld [vmem:[#allocation8 + $0x74] ss:$8 sps:$4 sm:$0xff]   ;;  %v3988_v7 = vld [vmem:[#allocation8 + $0x70] ss:$8 sps:$4 sm:$0xff]  }
 0x1f0   :  { %2125 = vmatpush1.bf16.msra.mxu0 %v3907_v8  ;;  %2289 = vmatpush1.bf16.msra.mxu1 %v3910_v9  ;;  %v3993_v8 = vld [vmem:[#allocation8 + $0x84] ss:$8 sps:$4 sm:$0xff]   ;;  %v3991_v9 = vld [vmem:[#allocation8 + $0x80] ss:$8 sps:$4 sm:$0xff]  }
 0x1f1   :  { %2126 = vmatprep.subr.bf16.mxu0 %v3915_v12  ;;  %2290 = vmatprep.subr.bf16.mxu1 %v3918_v13  ;;  %v3996_v12 = vld [vmem:[#allocation8 + $0x94] ss:$8 sps:$4 sm:$0xff]   ;;  %v3994_v13 = vld [vmem:[#allocation8 + $0x90] ss:$8 sps:$4 sm:$0xff]  }
 0x1f4   :  { %2127 = vmatpush1.bf16.msra.mxu0 %v3913_v14  ;;  %2291 = vmatpush1.bf16.msra.mxu1 %v3916_v15  ;;  %v3999_v14 = vld [vmem:[#allocation8 + $0xa4] ss:$8 sps:$4 sm:$0xff]   ;;  %v3997_v15 = vld [vmem:[#allocation8 + $0xa0] ss:$8 sps:$4 sm:$0xff]  }
 0x1f5   :  { %2128 = vmatprep.subr.bf16.mxu0 %v3921_v16  ;;  %2292 = vmatprep.subr.bf16.mxu1 %v3924_v17  ;;  %v4002_v16 = vld [vmem:[#allocation8 + $0xb4] ss:$8 sps:$4 sm:$0xff]   ;;  %v4000_v17 = vld [vmem:[#allocation8 + $0xb0] ss:$8 sps:$4 sm:$0xff]  }
 0x1f8   :  { %2129 = vmatpush1.bf16.msra.mxu0 %v3919_v18  ;;  %2293 = vmatpush1.bf16.msra.mxu1 %v3922_v19  ;;  %v4005_v18 = vld [vmem:[#allocation8 + $0xc4] ss:$8 sps:$4 sm:$0xff]   ;;  %v4003_v19 = vld [vmem:[#allocation8 + $0xc0] ss:$8 sps:$4 sm:$0xff]  }
 0x1f9   :  { %2130 = vmatprep.subr.bf16.mxu0 %v3927_v59  ;;  %2294 = vmatprep.subr.bf16.mxu1 %v3930_v20  ;;  %v4008_v59 = vld [vmem:[#allocation8 + $0xd4] ss:$8 sps:$4 sm:$0xff]   ;;  %v4006_v20 = vld [vmem:[#allocation8 + $0xd0] ss:$8 sps:$4 sm:$0xff]  }
 0x1fc   :  { %2131 = vmatpush1.bf16.msra.mxu0 %v3925_v21  ;;  %2295 = vmatpush1.bf16.msra.mxu1 %v3928_v22  ;;  %v4011_v21 = vld [vmem:[#allocation8 + $0xe4] ss:$8 sps:$4 sm:$0xff]   ;;  %v4009_v22 = vld [vmem:[#allocation8 + $0xe0] ss:$8 sps:$4 sm:$0xff]  }
 0x1fd   :  { %2132 = vmatprep.subr.bf16.mxu0 %v3933_v23  ;;  %2296 = vmatprep.subr.bf16.mxu1 %v3936_v24  ;;  %v4014_v23 = vld [vmem:[#allocation8 + $0xf4] ss:$8 sps:$4 sm:$0xff]   ;;  %v4012_v24 = vld [vmem:[#allocation8 + $0xf0] ss:$8 sps:$4 sm:$0xff]  }
 0x200   :  { %2133 = vmatpush1.bf16.msra.mxu0 %v3931_v25  ;;  %2297 = vmatpush1.bf16.msra.mxu1 %v3934_v11  ;;  %v4017_v25 = vld [vmem:[#allocation8 + $0x104] ss:$8 sps:$4 sm:$0xff]  }
 0x201   :  { %2134 = vmatprep.subr.bf16.mxu0 %v3939_v26  ;;  %2298 = vmatprep.subr.bf16.mxu1 %v3942_v27  ;;  %v4063_v11 = vld [vmem:[#allocation10 + $0x40] sm:$0xff]   ;;  %v4065_v27 = vld [vmem:[#allocation10 + $0x48] sm:$0xff]  }
 0x202   :  { %v4064_v26 = vld [vmem:[#allocation10] sm:$0xff]  }
 0x204   :  { %2135 = vmatpush1.bf16.msra.mxu0 %v3937_v28  ;;  %2299 = vmatpush1.bf16.msra.mxu1 %v3940_v29  ;;  %v4066_v28 = vld [vmem:[#allocation10 + $0x8] sm:$0xff]   ;;  %v4067_v29 = vld [vmem:[#allocation10 + $0x50] sm:$0xff]  }
 0x205   :  { %2136 = vmatprep.subr.bf16.mxu0 %v3945_v30  ;;  %2300 = vmatprep.subr.bf16.mxu1 %v3948_v31  ;;  %v4068_v30 = vld [vmem:[#allocation10 + $0x10] sm:$0xff]   ;;  %v4069_v31 = vld [vmem:[#allocation10 + $0x58] sm:$0xff]  }
 0x208   :  { %2137 = vmatpush1.bf16.msra.mxu0 %v3943_v32  ;;  %2301 = vmatpush1.bf16.msra.mxu1 %v3946_v33  ;;  %v4070_v32 = vld [vmem:[#allocation10 + $0x18] sm:$0xff]   ;;  %v4071_v33 = vld [vmem:[#allocation10 + $0x60] sm:$0xff]  }
 0x209   :  { %2138 = vmatprep.subr.bf16.mxu0 %v3951_v35  ;;  %2302 = vmatprep.subr.bf16.mxu1 %v3954_v36  ;;  %v4073_v35 = vld [vmem:[#allocation10 + $0x68] sm:$0xff]  }
 0x20a   :  { %v4074_v36 = vld [vmem:[#allocation10 + $0x28] sm:$0xff]  }
 0x20c   :  { %2139 = vmatpush1.bf16.msra.mxu0 %v3949_v41  ;;  %2303 = vmatpush1.bf16.msra.mxu1 %v3952_v10  ;;  %v4453_v41 = vld [vmem:[%s4497_s6 + $0x8] sm:$0xf] }
 0x20d   :  { %2140 = vmatprep.subr.bf16.mxu0 %v3957_v43  ;;  %2304 = vmatprep.subr.bf16.mxu1 %v3960_v44  ;;  %v692_v10 = vrot.slane %v4453_v41, %v4405_v38  ;;  %v696_v42 = vrot.slane %v4453_v41, %v4413_v40  ;;  %v704_v43 = vrot.slane %v4453_v41, %v141_v48 }
 0x210   :  { %2141 = vmatpush1.bf16.msra.mxu0 %v3955_v45  ;;  %2305 = vmatpush1.bf16.msra.mxu1 %v3958_v46 }
 0x211   :  { %2142 = vmatprep.subr.bf16.mxu0 %v3963_v47  ;;  %2306 = vmatprep.subr.bf16.mxu1 %v3966_v49 }
 0x214   :  { %2143 = vmatpush1.bf16.msra.mxu0 %v3961_v50  ;;  %2307 = vmatpush1.bf16.msra.mxu1 %v3964_v51 }
 0x215   :  { %2721 = vmatprep.subr.bf16.mxu0 %v3969_v39  ;;  %3480 = vmatprep.subr.bf16.mxu1 %v4063_v11  ;;  %v700_v11 = vrot.slane %v4453_v41, %v137_v55  ;;  %v4078_v55 = vld [vmem:[#allocation10 + $0x38] sm:$0xff]  }
 0x217   :  { %2145 = vmatmul.mubr.bf16.vlgmr.msra.gmra.mrb[0].mxu0 %v429_v54  ;;  %2309 = vmatmul.mubr.bf16.vlgmr.msra.gmra.mrb[16].mxu1 %v429_v54 }
 0x218   :  { %2722 = vmatpush1.bf16.msra.mxu0 %v3967_v53  ;;  %3481 = vmatpush3.bf16.msra.mxu1 %v4064_v26  ;;  %v4059_v26 = vld [vmem:[#allocation8 + $0x1e4] ss:$8 sps:$4 sm:$0xff]  }
 0x219   :  { %2723 = vmatprep.subr.bf16.mxu0 %v3972_v56  ;;  %3482 = vmatprep.subr.bf16.mxu1 %v4065_v27  ;;  %v4057_v27 = vld [vmem:[#allocation8 + $0x1e0] ss:$8 sps:$4 sm:$0xff]  }
 0x21c   :  { %2724 = vmatpush1.bf16.msra.mxu0 %v3970_v1  ;;  %3483 = vmatpush3.bf16.msra.mxu1 %v4066_v28 }
 0x21d   :  { %2725 = vmatprep.subr.bf16.mxu0 %v3975_v57  ;;  %3484 = vmatprep.subr.bf16.mxu1 %v4067_v29  ;;  %v4062_v29 = vld [vmem:[#allocation8 + $0x1f4] ss:$8 sps:$4 sm:$0xff]  }
 0x220   :  { %2726 = vmatpush1.bf16.msra.mxu0 %v3973_v58  ;;  %3485 = vmatpush3.bf16.msra.mxu1 %v4068_v30  ;;  %v4015_v58 = vld [vmem:[#allocation8 + $0x100] ss:$8 sps:$4 sm:$0xff]   ;;  %v4060_v30 = vld [vmem:[#allocation8 + $0x1f0] ss:$8 sps:$4 sm:$0xff]  }
 0x221   :  { %2727 = vmatprep.subr.bf16.mxu0 %v3978_v60  ;;  %3486 = vmatprep.subr.bf16.mxu1 %v4069_v31 }
 0x224   :  { %2728 = vmatpush1.bf16.msra.mxu0 %v3976_v61  ;;  %3487 = vmatpush3.bf16.msra.mxu1 %v4070_v32  ;;  %v4020_v61 = vld [vmem:[#allocation8 + $0x114] ss:$8 sps:$4 sm:$0xff]  }
 0x225   :  { %2729 = vmatprep.subr.bf16.mxu0 %v3981_v62  ;;  %3488 = vmatprep.subr.bf16.mxu1 %v4071_v33  ;;  %v4018_v62 = vld [vmem:[#allocation8 + $0x110] ss:$8 sps:$4 sm:$0xff]  }
 0x226   :  { %v4075_v33 = vld [vmem:[#allocation10 + $0x70] sm:$0xff]  }
 0x228   :  { %2730 = vmatpush1.bf16.msra.mxu0 %v3979_v63  ;;  %3489 = vmatpush3.bf16.msra.mxu1 %v4072_v34  ;;  %v4023_v63 = vld [vmem:[#allocation8 + $0x124] ss:$8 sps:$4 sm:$0xff]   ;;  %v4076_v34 = vld [vmem:[#allocation10 + $0x30] sm:$0xff]  }
 0x229   :  { %2731 = vmatprep.subr.bf16.mxu0 %v3984_v0  ;;  %3490 = vmatprep.subr.bf16.mxu1 %v4073_v35  ;;  %v4021_v0 = vld [vmem:[#allocation8 + $0x120] ss:$8 sps:$4 sm:$0xff]   ;;  %v4266_v35 = vmov 0.0  }
 0x22c   :  { %2732 = vmatpush1.bf16.msra.mxu0 %v3982_v2  ;;  %3491 = vmatpush3.bf16.msra.mxu1 %v4074_v36  ;;  %v4026_v2 = vld [vmem:[#allocation8 + $0x134] ss:$8 sps:$4 sm:$0xff]   ;;  %v2389_v36 = vld [vmem:[%s4497_s6 + $0xc] sm:$0x3] }
 0x22d   :  { %2733 = vmatprep.subr.bf16.mxu0 %v3987_v3  ;;  %v4024_v3 = vld [vmem:[#allocation8 + $0x130] ss:$8 sps:$4 sm:$0xff]   ;;  %3492 = vmatprep.subr.bf16.mxu1 %v4075_v33  ;;  %v2394_v41 = vrot.slane %v2389_v36, %v4405_v38 }
 0x22e   :  { %v4081_v38 = vld [vmem:[#allocation11 + $0x10] sm:$0xff]  }
 0x230   :  { %2734 = vmatpush1.bf16.msra.mxu0 %v3985_v5  ;;  %v4029_v5 = vld [vmem:[#allocation8 + $0x144] ss:$8 sps:$4 sm:$0xff]   ;;  %3493 = vmatpush3.bf16.msra.mxu1 %v4076_v34 }
 0x231   :  { %2735 = vmatprep.subr.bf16.mxu0 %v3990_v6  ;;  %v4027_v6 = vld [vmem:[#allocation8 + $0x140] ss:$8 sps:$4 sm:$0xff]   ;;  %3494 = vmatprep.subr.bf16.mxu1 %v4077_v37 }
 0x234   :  { %2736 = vmatpush1.bf16.msra.mxu0 %v3988_v7  ;;  %v4032_v7 = vld [vmem:[#allocation8 + $0x154] ss:$8 sps:$4 sm:$0xff]   ;;  %3495 = vmatpush3.bf16.msra.mxu1 %v4078_v55 }
 0x235   :  { %2737 = vmatprep.subr.bf16.mxu0 %v3993_v8  ;;  %v4030_v8 = vld [vmem:[#allocation8 + $0x150] ss:$8 sps:$4 sm:$0xff]   ;;  %3511 = vmatprep.subr.bf16.mxu1 %v4266_v35 }
 0x238   :  { %2738 = vmatpush1.bf16.msra.mxu0 %v3991_v9  ;;  %v4035_v9 = vld [vmem:[#allocation8 + $0x164] ss:$8 sps:$4 sm:$0xff]  }
 0x239   :  { %2739 = vmatprep.subr.bf16.mxu0 %v3996_v12  ;;  %v4033_v12 = vld [vmem:[#allocation8 + $0x160] ss:$8 sps:$4 sm:$0xff]  }
 0x23c   :  { %2740 = vmatpush1.bf16.msra.mxu0 %v3994_v13  ;;  %v4038_v13 = vld [vmem:[#allocation8 + $0x174] ss:$8 sps:$4 sm:$0xff]  }
 0x23d   :  { %2741 = vmatprep.subr.bf16.mxu0 %v3999_v14  ;;  %v4036_v14 = vld [vmem:[#allocation8 + $0x170] ss:$8 sps:$4 sm:$0xff]  }
 0x240   :  { %2742 = vmatpush1.bf16.msra.mxu0 %v3997_v15  ;;  %v4041_v15 = vld [vmem:[#allocation8 + $0x184] ss:$8 sps:$4 sm:$0xff]  }
 0x241   :  { %2743 = vmatprep.subr.bf16.mxu0 %v4002_v16  ;;  %v4039_v16 = vld [vmem:[#allocation8 + $0x180] ss:$8 sps:$4 sm:$0xff]  }
 0x244   :  { %2744 = vmatpush1.bf16.msra.mxu0 %v4000_v17  ;;  %v4044_v17 = vld [vmem:[#allocation8 + $0x194] ss:$8 sps:$4 sm:$0xff]  }
 0x245   :  { %2745 = vmatprep.subr.bf16.mxu0 %v4005_v18  ;;  %v4042_v18 = vld [vmem:[#allocation8 + $0x190] ss:$8 sps:$4 sm:$0xff]  }
 0x248   :  { %2746 = vmatpush1.bf16.msra.mxu0 %v4003_v19  ;;  %v4047_v19 = vld [vmem:[#allocation8 + $0x1a4] ss:$8 sps:$4 sm:$0xff]  }
 0x249   :  { %2747 = vmatprep.subr.bf16.mxu0 %v4008_v59  ;;  %v4045_v59 = vld [vmem:[#allocation8 + $0x1a0] ss:$8 sps:$4 sm:$0xff]  }
 0x24c   :  { %2748 = vmatpush1.bf16.msra.mxu0 %v4006_v20  ;;  %v4050_v20 = vld [vmem:[#allocation8 + $0x1b4] ss:$8 sps:$4 sm:$0xff]  }
 0x24d   :  { %2749 = vmatprep.subr.bf16.mxu0 %v4011_v21  ;;  %v4048_v21 = vld [vmem:[#allocation8 + $0x1b0] ss:$8 sps:$4 sm:$0xff]  }
 0x250   :  { %2750 = vmatpush1.bf16.msra.mxu0 %v4009_v22  ;;  %v4053_v22 = vld [vmem:[#allocation8 + $0x1c4] ss:$8 sps:$4 sm:$0xff]  }
 0x251   :  { %2751 = vmatprep.subr.bf16.mxu0 %v4014_v23  ;;  %v4051_v23 = vld [vmem:[#allocation8 + $0x1c0] ss:$8 sps:$4 sm:$0xff]  }
 0x254   :  { %2752 = vmatpush1.bf16.msra.mxu0 %v4012_v24  ;;  %v4056_v24 = vld [vmem:[#allocation8 + $0x1d4] ss:$8 sps:$4 sm:$0xff]  }
 0x255   :  { %2762 = vmatprep.subr.bf16.mxu0 %v4017_v25  ;;  %v4054_v25 = vld [vmem:[#allocation8 + $0x1d0] ss:$8 sps:$4 sm:$0xff]  }
 0x2ea   :  { %v2146_v44 = vpop.f32.mrb[0].mxu0  ;;  %v4462_v45 = vpop.f32.mrb[16].mxu1 }
 0x2eb   :  { %v3531_v46 = vadd.f32 %v2146_v44, %v692_v10  ;;  %v2148_v4 = vpop.f32.mrb[1].mxu0  ;;  %v2312_v47 = vpop.f32.mrb[17].mxu1  ;;  %v3533_v28 = vadd.f32 %v4462_v45, %v700_v11  ;;  %v2398_v10 = vrot.slane %v2389_v36, %v4413_v40  ;;  %v4082_v40 = vld [vmem:[#allocation11 + $0x18] sm:$0xff]  }
 0x2ec   :  { %v3532_v49 = vadd.f32 %v2148_v4, %v696_v42  ;;  %v3534_v50 = vadd.f32 %v2312_v47, %v704_v43  ;;  %v2150_v51 = vpop.f32.mrb[2].mxu0  ;;  %v2314_v52 = vpop.f32.mrb[18].mxu1 }
 0x2ed   :  { %v2317_v39 = vmax.f32 %v3531_v46, 0.0  ;;  %v2151_v53 = vpop.f32.mrb[3].mxu0  ;;  %v2315_v54 = vpop.f32.mrb[19].mxu1  ;;  %v2319_v31 = vmax.f32 %v3533_v28, 0.0  ;;  %v4079_v51 = vld [vmem:[#allocation11] sm:$0xff]  }
 0x2ee   :  { %v2318_v56 = vmax.f32 %v3532_v49, 0.0  ;;  %v2320_v1 = vmax.f32 %v3534_v50, 0.0  ;;  %v4083_v53 = vld [vmem:[#allocation11 + $0x20] sm:$0xff]   ;;  %v4084_v54 = vld [vmem:[#allocation11 + $0x28] sm:$0xff]  }
 0x2ef   :  { %v2321_v60 = vpack.c.bf16 %v2317_v39, %v2317_v39  ;;  %v2323_v32 = vpack.c.bf16 %v2319_v31, %v2319_v31  ;;  %v4080_v39 = vld [vmem:[#allocation11 + $0x8] sm:$0xff]  }
 0x2f0   :  { %v2322_v57 = vpack.c.bf16 %v2318_v56, %v2318_v56  ;;  %v2324_v48 = vpack.c.bf16 %v2320_v1, %v2320_v1  ;;  %v4085_v56 = vld [vmem:[#allocation11 + $0x30] sm:$0xff]   ;;  %v4086_v1 = vld [vmem:[#allocation11 + $0x38] sm:$0xff]  }
 0x2f2   :  { %2753 = vmatprep.mubr.bf16.mxu0 %v2322_v57 }
 0x2f3   :  { %2754 = vmatmul.mubr.bf16.vlgmr.msra.gmra.mrb[4].mxu0 %v2321_v60 }
 0x2f4   :  { %2763 = vmatpush1.bf16.msra.mxu0 %v4015_v58  ;;  %2794 = vmatprep.mubr.bf16.mxu0 %v2324_v48  ;;  %v3454_v58 = vld [vmem:[%s4497_s6 + $0xe] ss:$0 sm:$0xff] }
 0x2f5   :  { %2764 = vmatprep.subr.bf16.mxu0 %v4020_v61 }
 0x2f8   :  { %2765 = vmatpush1.bf16.msra.mxu0 %v4018_v62 }
 0x2f9   :  { %2766 = vmatprep.subr.bf16.mxu0 %v4023_v63 }
 0x2fc   :  { %2767 = vmatpush1.bf16.msra.mxu0 %v4021_v0 }
 0x2fd   :  { %2768 = vmatprep.subr.bf16.mxu0 %v4026_v2 }
 0x300   :  { %2769 = vmatpush1.bf16.msra.mxu0 %v4024_v3  ;;  %v3471_v3 = vld [vmem:[%s4497_s6 + $0xf] ss:$0 sm:$0xff] }
 0x301   :  { %2770 = vmatprep.subr.bf16.mxu0 %v4029_v5 }
 0x304   :  { %2771 = vmatpush1.bf16.msra.mxu0 %v4027_v6 }
 0x305   :  { %2772 = vmatprep.subr.bf16.mxu0 %v4032_v7 }
 0x308   :  { %2773 = vmatpush1.bf16.msra.mxu0 %v4030_v8 }
 0x309   :  { %2774 = vmatprep.subr.bf16.mxu0 %v4035_v9 }
 0x30c   :  { %2775 = vmatpush1.bf16.msra.mxu0 %v4033_v12 }
 0x30d   :  { %2776 = vmatprep.subr.bf16.mxu0 %v4038_v13 }
 0x310   :  { %2777 = vmatpush1.bf16.msra.mxu0 %v4036_v14 }
 0x311   :  { %2778 = vmatprep.subr.bf16.mxu0 %v4041_v15 }
 0x314   :  { %2779 = vmatpush1.bf16.msra.mxu0 %v4039_v16 }
 0x315   :  { %2780 = vmatprep.subr.bf16.mxu0 %v4044_v17 }
 0x318   :  { %2781 = vmatpush1.bf16.msra.mxu0 %v4042_v18 }
 0x319   :  { %2782 = vmatprep.subr.bf16.mxu0 %v4047_v19 }
 0x31c   :  { %2783 = vmatpush1.bf16.msra.mxu0 %v4045_v59 }
 0x31d   :  { %2784 = vmatprep.subr.bf16.mxu0 %v4050_v20 }
 0x320   :  { %2785 = vmatpush1.bf16.msra.mxu0 %v4048_v21 }
 0x321   :  { %2786 = vmatprep.subr.bf16.mxu0 %v4053_v22 }
 0x324   :  { %2787 = vmatpush1.bf16.msra.mxu0 %v4051_v23 }
 0x325   :  { %2788 = vmatprep.subr.bf16.mxu0 %v4056_v24 }
 0x328   :  { %2789 = vmatpush1.bf16.msra.mxu0 %v4054_v25 }
 0x329   :  { %2790 = vmatprep.subr.bf16.mxu0 %v4059_v26 }
 0x32c   :  { %2791 = vmatpush1.bf16.msra.mxu0 %v4057_v27 }
 0x32d   :  { %2792 = vmatprep.subr.bf16.mxu0 %v4062_v29 }
 0x330   :  { %2793 = vmatpush1.bf16.msra.mxu0 %v4060_v30 }
 0x333   :  { %2795 = vmatmul.mubr.bf16.vlgmr.msra.gmra.mrb[4].mxu0 %v2323_v32 }
 0x406   :  { %v2796_v42 = vpop.f32.mrb[4].mxu0 }
 0x407   :  { %v3535_v43 = vadd.f32 %v2796_v42, %v2394_v41  ;;  %v2798_v44 = vpop.f32.mrb[5].mxu0 }
 0x408   :  { %v3536_v45 = vadd.f32 %v2798_v44, %v2398_v10  ;;  %v2800_v46 = vpop.f32.mrb[6].mxu0 }
 0x409   :  { %v2803_v4 = vmax.f32 %v3535_v43, 0.0  ;;  %v2801_v47 = vpop.f32.mrb[7].mxu0 }
 0x40a   :  { %v2804_v49 = vmax.f32 %v3536_v45, 0.0 }
 0x40b   :  { %v2805_v52 = vpack.c.bf16 %v2803_v4, %v2803_v4 }
 0x40c   :  { %v2806_v50 = vpack.c.bf16 %v2804_v49, %v2804_v49 }
 0x40e   :  { %2974 = vmatprep.mubr.bf16.mxu1 %v2806_v50 }
 0x40f   :  { %2975 = vmatmul.mubr.bf16.vlgmr.msra.gmra.mrb[20].mxu1 %v2805_v52 }
 0x410   :  { %3512 = vmatpush3.bf16.msra.mxu1 %v4079_v51  ;;  %3527 = vmatprep.mubr.msk.bf16.mxu1 %vm4267_vm1, %v4266_v35 }
 0x411   :  { %3513 = vmatprep.subr.bf16.mxu1 %v4266_v35 }
 0x414   :  { %3514 = vmatpush3.bf16.msra.mxu1 %v4080_v39 }
 0x415   :  { %3515 = vmatprep.subr.bf16.mxu1 %v4266_v35 }
 0x418   :  { %3516 = vmatpush3.bf16.msra.mxu1 %v4081_v38 }
 0x419   :  { %3517 = vmatprep.subr.bf16.mxu1 %v4266_v35 }
 0x41c   :  { %3518 = vmatpush3.bf16.msra.mxu1 %v4082_v40 }
 0x41d   :  { %3519 = vmatprep.subr.bf16.mxu1 %v4266_v35 }
 0x420   :  { %3520 = vmatpush3.bf16.msra.mxu1 %v4083_v53 }
 0x421   :  { %3521 = vmatprep.subr.bf16.mxu1 %v4266_v35 }
 0x424   :  { %3522 = vmatpush3.bf16.msra.mxu1 %v4084_v54 }
 0x425   :  { %3523 = vmatprep.subr.bf16.mxu1 %v4266_v35 }
 0x428   :  { %3524 = vmatpush3.bf16.msra.mxu1 %v4085_v56 }
 0x429   :  { %3525 = vmatprep.subr.bf16.mxu1 %v4266_v35 }
 0x42c   :  { %3526 = vmatpush3.bf16.msra.mxu1 %v4086_v1 }
 0x4e2   :  { %v3496_v57 = vpop.f32.mrb[20].mxu1 }
 0x4e3   :  { %v3497_v60 = vpop.f32.mrb[21].mxu1 }
 0x4e4   :  { %v3498_v61 = vadd.f32 %v3497_v60, %v3496_v57  ;;  %v3499_v48 = vpop.f32.mrb[22].mxu1 }
 0x4e5   :  { %v3500_v62 = vpop.f32.mrb[23].mxu1 }
 0x4e6   :  { %v2977_v63 = vadd.f32 %v3498_v61, %v3454_v58 }
 0x4e8   :  { %v2982_v0 = vmax.f32 %v2977_v63, 0.0 }
 0x4ea   :  { %v2983_v2 = vpack.c.bf16 %v2982_v0, %v2982_v0 }
 0x4ec   :  { %3528 = vmatmul.mubr.bf16.vlgmr.msra.gmra.mrb[24].mxu1 %v2983_v2 }
 0x5bf   :  { %v3089_v5 = vpop.f32.mrb[24].mxu1 }
 0x5c0   :  { %v3090_v6 = vadd.f32 %v3471_v3, %v3089_v5  ;;  %v3529_v7 = vpop.f32.mrb[25].mxu1 }
 0x5c1   :  { %v3092_v8 = vpop.f32.mrb[26].mxu1 }
 0x5c2   :  { %3095 = vst [vmem:[#allocation13] sm:$0xff] %v3090_v6  ;;  %v3530_v9 = vpop.f32.mrb[27].mxu1 }
 0x5c3   :  { %4230 = shalt.err (!%p4227_p10)
}
 0x5c4   :  { %s4231_s6 = scalar_lea.hbm %s4498_s7, 128 }
 0x5c5   :  { %p4232_p11 = scmp.ne.s32.totalorder %s4498_s7, %s4231_s6  ;;  %p4235_p12 = scmp.lt.u32.totalorder %s4231_s6, %s4498_s7 }
 0x5c7   :  { %p4237_p13 = pnand %p4235_p12, %p4232_p11 }
 0x5c9   :  { %4240 = shalt.err (!%p4237_p13)
}
 0x5ca   :  { %3105 = dma.vmem_to_hbm [thread:$0]  %s3103_s14, 128, %s4498_s7, [#allocation4]  }
 0x5cb   :  { %4249 = dma.done.wait [#allocation4], 128  }
 0x5cc   :  { %4250 = vsyncadd [#allocation4], 4294967168 }
 0x5cd   :  { %3109 = vsyncpa [#allocation3], 1 }
 0x5ce   :  { %3110 = vsyncpa [#allocation6], 1 }
 0x5cf   :  { %3111 = vsyncpa [#allocation9], 1 }
 0x5d0   :  { %3112 = vsyncpa [#allocation12], 1 }
 0x5d1   :  { %3113 = vsyncpa [#allocation4], 1 }

</bundles_post_ra>
